<compile_context>
chip_gen: v7x
topology: tpu7x:2x2x1
jax: 0.10.0
libtpu: 0.0.40
codegen_flags: <defaults>
</compile_context>

<pallas_src>
import functools

import jax
import jax.numpy as jnp
from jax.experimental import pallas as pl
from jax.experimental.pallas import tpu as pltpu


def encoder_stack_kernel(n_head, B, S,
                         x_ref,
                         wqkv_ref, bqkv_ref,
                         wo_ref, bo_ref,
                         wf_ref, bf_ref,
                         g1_ref, b1_ref,
                         g2_ref, b2_ref,
                         o_ref,
                         act_ref):
    """One grid step == one encoder layer applied to the full (B*S, D) batch."""
    l = pl.program_id(0)
    n_layers = pl.num_programs(0)

    # Layer 0: load the input activations into the f32 VMEM carry.
    @pl.when(l == 0)
    def _():
        act_ref[...] = x_ref[...].astype(jnp.float32)

    x = act_ref[...]                               # (B*S, D) float32 carry
    BS, D = x.shape
    H = n_head
    dk = D // H
    scale = 1.0 / jnp.sqrt(jnp.float32(dk))
    mmdt = wqkv_ref.dtype                          # matmul operand dtype (f32 or bf16)

    # ---- fused QKV projection: one (BS,D) @ (D,3D) MXU matmul ----
    qkv = jnp.dot(x.astype(mmdt), wqkv_ref[0],
                  preferred_element_type=jnp.float32) + bqkv_ref[0]   # (BS, 3D) f32
    q = qkv[:, :D] * scale          # fold 1/sqrt(dk) into q (cheaper than scaling SxS scores)
    k = qkv[:, D:2 * D]
    v = qkv[:, 2 * D:]

    # Batched layout for attention — leading-dim split only, lane dim untouched.
    q3 = q.reshape(B, S, D)
    k3 = k.reshape(B, S, D).astype(mmdt)
    v3 = v.reshape(B, S, D).astype(mmdt)

    # Per-head lane masks: full-width (D-lane) ops, no sub-128-lane slices.
    lane = jax.lax.broadcasted_iota(jnp.int32, (1, D), 1)             # (1, D)

    ctx = jnp.zeros((B, S, D), jnp.float32)
    for h in range(H):                                                # H is small & static
        mask = ((lane >= h * dk) & (lane < (h + 1) * dk)).astype(jnp.float32)
        qh = (q3 * mask).astype(mmdt)                                 # zero other heads' cols
        s = jnp.einsum('bqd,bkd->bqk', qh, k3,
                       preferred_element_type=jnp.float32)            # (B, S, S) head-h scores
        s = s - jnp.max(s, axis=-1, keepdims=True)
        p = jnp.exp(s)
        p = p * pl.reciprocal(jnp.sum(p, axis=-1, keepdims=True), approx=True)
        vh = v3 * mask.astype(mmdt)
        # head-h output lands only in head-h's columns -> sum over heads == concat
        ctx = ctx + jnp.einsum('bqk,bkd->bqd', p.astype(mmdt), vh,
                               preferred_element_type=jnp.float32)

    # ---- single full-width attention output projection ----
    attn = jnp.dot(ctx.reshape(BS, D).astype(mmdt), wo_ref[0],
                   preferred_element_type=jnp.float32) + bo_ref[0]

    def layer_norm(y, gamma, beta):                                   # f32 elementwise
        mu = jnp.mean(y, axis=-1, keepdims=True)
        d = y - mu
        var = jnp.mean(d * d, axis=-1, keepdims=True)
        return d * jax.lax.rsqrt(var + 1e-6) * gamma + beta           # eps=1e-6 as in the module

    x1 = layer_norm(x + attn, g1_ref[0], b1_ref[0])                   # residual + norm1
    ff = jnp.dot(x1.astype(mmdt), wf_ref[0],
                 preferred_element_type=jnp.float32) + bf_ref[0]      # single-Linear feedforward
    out = layer_norm(ff + x1, g2_ref[0], b2_ref[0])                   # residual + norm2

    act_ref[...] = out                                                # carry to next layer

    @pl.when(l == n_layers - 1)
    def _():
        o_ref[...] = out.astype(o_ref.dtype)                          # single final store


def transformer_encoder(x, params, n_head):
    """x: (B, S, D).  params: dict of per-layer-stacked weights (leading layer axis)."""
    B, S, D = x.shape
    BS = B * S
    L = params["wqkv"].shape[0]
    x2 = x.reshape(BS, D)

    kernel = functools.partial(encoder_stack_kernel, n_head, B, S)

    def wspec(arr):
        # one layer's slab per grid step; streamed (double-buffered) over the layer axis
        return pl.BlockSpec((1,) + arr.shape[1:], lambda l: (l, 0, 0))

    in_specs = [pl.BlockSpec((BS, D), lambda l: (0, 0))]              # x: constant block (fetched once)
    in_specs += [wspec(params[k]) for k in
                 ("wqkv", "bqkv", "wo", "bo", "wf", "bf", "g1", "b1", "g2", "b2")]

    out = pl.pallas_call(
        kernel,
        out_shape=jax.ShapeDtypeStruct((BS, D), x.dtype),
        grid=(L,),
        in_specs=in_specs,
        out_specs=pl.BlockSpec((BS, D), lambda l: (0, 0)),            # resident across layers
        scratch_shapes=[pltpu.VMEM((BS, D), jnp.float32)],            # f32 activation carry
        compiler_params=pltpu.CompilerParams(
            dimension_semantics=("arbitrary",)),                      # layer axis is sequential
        # TODO(synk): on v7x (2 TCs), reintroduce a leading "parallel" batch-tile
        # axis (extent >= 2) and set vmem_limit_bytes if d_model / seq are scaled up.
    )(x2, params["wqkv"], params["bqkv"], params["wo"], params["bo"],
      params["wf"], params["bf"], params["g1"], params["b1"],
      params["g2"], params["b2"])
    return out.reshape(B, S, D)


def init_layer_params(key, d_model):
    """Random per-layer params, weights already in (in, out) layout."""
    ks = jax.random.split(key, 5)
    scale = 0.02
    wq, wk, wv, wo, wf = [
        (scale * jax.random.normal(k, (d_model, d_model))).astype(jnp.float32)
        for k in ks
    ]
    zeros = jnp.zeros((1, d_model), jnp.float32)
    ones = jnp.ones((1, d_model), jnp.float32)
    return dict(
        wqkv=jnp.concatenate([wq, wk, wv], axis=-1),       # (D, 3D) fused QKV weight
        bqkv=jnp.zeros((1, 3 * d_model), jnp.float32),
        wo=wo, bo=zeros,
        wf=wf, bf=zeros,
        g1=ones, b1=zeros,
        g2=ones, b2=zeros,
    )


def stack_layer_params(layer_params_list, matmul_dtype=jnp.float32):
    """Stack per-layer dicts along a leading layer axis; cast matmul weights."""
    stacked = {k: jnp.stack([p[k] for p in layer_params_list], axis=0)
               for k in layer_params_list[0]}
    for k in ("wqkv", "wo", "wf"):
        stacked[k] = stacked[k].astype(matmul_dtype)
    return stacked


if __name__ == "__main__":
    n_head = 4
    d_model = 32
    n_layers = 2
    batch = 2
    seq = 8

    # bfloat16 is the recommended MXU operand dtype on v6e/v7x (halves weight
    # DMA); float32 default matches the f32 PyTorch reference numerics and
    # v5e's f32-only VPU/EUP.
    matmul_dtype = jnp.float32

    key = jax.random.PRNGKey(0)
    k_in, *k_layers = jax.random.split(key, 1 + n_layers)

    x = jax.random.normal(k_in, (batch, seq, d_model), dtype=jnp.float32)
    layer_params = [init_layer_params(k, d_model) for k in k_layers]
    params = stack_layer_params(layer_params, matmul_dtype)

    out = transformer_encoder(x, params, n_head)
    out = jax.block_until_ready(out)
    assert out.shape == (batch, seq, d_model)
    assert bool(jnp.all(jnp.isfinite(out)))
    print("KERNEL_OK")
</pallas_src>

<mosaic_0001>
module attributes {stable_mosaic.version = 11 : i64} {
  func.func @encoder_stack_kernel(%arg0: i32, %arg1: memref<16x32xf32, #tpu.memory_space<vmem>>, %arg2: memref<1x32x96xf32, #tpu.memory_space<vmem>>, %arg3: memref<1x1x96xf32, #tpu.memory_space<vmem>>, %arg4: memref<1x32x32xf32, #tpu.memory_space<vmem>>, %arg5: memref<1x1x32xf32, #tpu.memory_space<vmem>>, %arg6: memref<1x32x32xf32, #tpu.memory_space<vmem>>, %arg7: memref<1x1x32xf32, #tpu.memory_space<vmem>>, %arg8: memref<1x1x32xf32, #tpu.memory_space<vmem>>, %arg9: memref<1x1x32xf32, #tpu.memory_space<vmem>>, %arg10: memref<1x1x32xf32, #tpu.memory_space<vmem>>, %arg11: memref<1x1x32xf32, #tpu.memory_space<vmem>>, %arg12: memref<16x32xf32, #tpu.memory_space<vmem>>, %arg13: memref<16x32xf32, #tpu.memory_space<vmem>>) attributes {dimension_semantics = [#tpu.dimension_semantics<arbitrary>], iteration_bounds = array<i64: 2>, scalar_prefetch = 0 : i64, scratch_operands = 1 : i64, tpu.core_type = #tpu.core_type<tc>, window_params = [{pipeline_mode = #tpu.pipeline_mode<synchronous>, transform_indices = @transform_0, window_bounds = array<i64: 16, 32>}, {transform_indices = @transform_1, window_bounds = array<i64: 1, 32, 96>}, {transform_indices = @transform_2, window_bounds = array<i64: 1, 1, 96>}, {transform_indices = @transform_3, window_bounds = array<i64: 1, 32, 32>}, {transform_indices = @transform_4, window_bounds = array<i64: 1, 1, 32>}, {transform_indices = @transform_5, window_bounds = array<i64: 1, 32, 32>}, {transform_indices = @transform_6, window_bounds = array<i64: 1, 1, 32>}, {transform_indices = @transform_7, window_bounds = array<i64: 1, 1, 32>}, {transform_indices = @transform_8, window_bounds = array<i64: 1, 1, 32>}, {transform_indices = @transform_9, window_bounds = array<i64: 1, 1, 32>}, {transform_indices = @transform_10, window_bounds = array<i64: 1, 1, 32>}, {pipeline_mode = #tpu.pipeline_mode<synchronous>, transform_indices = @transform_11, window_bounds = array<i64: 16, 32>}]} {
    %c0_i32 = arith.constant 0 : i32
    %0 = arith.cmpi eq, %arg0, %c0_i32 : i32
    %1 = arith.extui %0 : i1 to i32
    %c0_i32_0 = arith.constant 0 : i32
    %2 = arith.cmpi ne, %1, %c0_i32_0 : i32
    scf.if %2 {
      %c0_70 = arith.constant 0 : index
      %c0_71 = arith.constant 0 : index
      %196 = vector.load %arg1[%c0_70, %c0_71] : memref<16x32xf32, #tpu.memory_space<vmem>>, vector<16x32xf32>
      %c0_72 = arith.constant 0 : index
      %c0_73 = arith.constant 0 : index
      %197 = vector.load %arg13[%c0_72, %c0_73] : memref<16x32xf32, #tpu.memory_space<vmem>>, vector<16x32xf32>
      tpu.vector_store %arg13[%c0_72, %c0_73], %196 {strides = array<i32>} : memref<16x32xf32, #tpu.memory_space<vmem>>, vector<16x32xf32>,
    } else {
    }
    %c0 = arith.constant 0 : index
    %c0_1 = arith.constant 0 : index
    %3 = vector.load %arg13[%c0, %c0_1] : memref<16x32xf32, #tpu.memory_space<vmem>>, vector<16x32xf32>
    %cst = arith.constant 8.000000e+00 : f32
    %4 = math.sqrt %cst : f32
    %cst_2 = arith.constant 1.000000e+00 : f32
    %5 = arith.divf %cst_2, %4 : f32
    %c0_3 = arith.constant 0 : index
    %c0_4 = arith.constant 0 : index
    %c0_5 = arith.constant 0 : index
    %6 = vector.load %arg2[%c0_3, %c0_4, %c0_5] : memref<1x32x96xf32, #tpu.memory_space<vmem>>, vector<1x32x96xf32>
    %7 = vector.shape_cast %6 : vector<1x32x96xf32> to vector<32x96xf32>
    %cst_6 = arith.constant dense<0.000000e+00> : vector<16x96xf32>
    %8 = tpu.matmul %3, %7, %cst_6 {dimension_numbers = #tpu.dot_dimension_numbers<[1], [0], [0], [1], [0, 0, 1, 1], [], []>} : vector<16x32xf32>, vector<32x96xf32>, vector<16x96xf32> -> vector<16x96xf32>
    %c0_7 = arith.constant 0 : index
    %c0_8 = arith.constant 0 : index
    %c0_9 = arith.constant 0 : index
    %9 = vector.load %arg3[%c0_7, %c0_8, %c0_9] : memref<1x1x96xf32, #tpu.memory_space<vmem>>, vector<1x1x96xf32>
    %10 = vector.shape_cast %9 : vector<1x1x96xf32> to vector<1x96xf32>
    %11 = vector.broadcast %10 : vector<1x96xf32> to vector<16x96xf32>
    %12 = arith.addf %8, %11 : vector<16x96xf32>
    %13 = vector.extract_strided_slice %12 {offsets = [0, 0], sizes = [16, 32], strides = [1, 1]} : vector<16x96xf32> to vector<16x32xf32>
    %14 = vector.broadcast %5 : f32 to vector<16x32xf32>
    %15 = arith.mulf %13, %14 : vector<16x32xf32>
    %16 = vector.extract_strided_slice %12 {offsets = [0, 32], sizes = [16, 32], strides = [1, 1]} : vector<16x96xf32> to vector<16x32xf32>
    %17 = vector.extract_strided_slice %12 {offsets = [0, 64], sizes = [16, 32], strides = [1, 1]} : vector<16x96xf32> to vector<16x32xf32>
    %18 = vector.shape_cast %15 : vector<16x32xf32> to vector<2x8x32xf32>
    %19 = vector.shape_cast %16 : vector<16x32xf32> to vector<2x8x32xf32>
    %20 = vector.shape_cast %17 : vector<16x32xf32> to vector<2x8x32xf32>
    %21 = tpu.iota {dimensions = array<i32: 1>} : vector<1x32xi32>
    %cst_10 = arith.constant 0.000000e+00 : f32
    %22 = vector.broadcast %cst_10 : f32 to vector<2x8x32xf32>
    %c0_i32_11 = arith.constant 0 : i32
    %23 = vector.broadcast %c0_i32_11 : i32 to vector<1x32xi32>
    %24 = arith.cmpi sge, %21, %23 : vector<1x32xi32>
    %c8_i32 = arith.constant 8 : i32
    %25 = vector.broadcast %c8_i32 : i32 to vector<1x32xi32>
    %26 = arith.cmpi slt, %21, %25 : vector<1x32xi32>
    %27 = arith.andi %24, %26 : vector<1x32xi1>
    %28 = arith.extui %27 : vector<1x32xi1> to vector<1x32xi32>
    %29 = arith.sitofp %28 : vector<1x32xi32> to vector<1x32xf32>
    %30 = vector.shape_cast %29 : vector<1x32xf32> to vector<1x1x32xf32>
    %31 = vector.broadcast %30 : vector<1x1x32xf32> to vector<2x8x32xf32>
    %32 = arith.mulf %18, %31 : vector<2x8x32xf32>
    "tpu.trace_start"() <{level = 10 : i32, message = "bqd,bkd->bqk"}> : () -> ()
    %cst_12 = arith.constant dense<0.000000e+00> : vector<2x8x8xf32>
    %33 = tpu.matmul %32, %19, %cst_12 {dimension_numbers = #tpu.dot_dimension_numbers<[2], [2], [1], [1], [0, 0, 0, 1, 1, 1], [0], [0]>} : vector<2x8x32xf32>, vector<2x8x32xf32>, vector<2x8x8xf32> -> vector<2x8x8xf32>
    "tpu.trace_stop"() : () -> ()
    %cst_13 = arith.constant dense<0xFF800000> : vector<2x8xf32>
    %34 = vector.multi_reduction <maximumf>, %33, %cst_13 [2] : vector<2x8x8xf32> to vector<2x8xf32>
    %35 = vector.shape_cast %34 : vector<2x8xf32> to vector<2x8x1xf32>
    %36 = vector.broadcast %35 : vector<2x8x1xf32> to vector<2x8x8xf32>
    %37 = arith.subf %33, %36 : vector<2x8x8xf32>
    %38 = math.exp %37 : vector<2x8x8xf32>
    %cst_14 = arith.constant dense<0.000000e+00> : vector<2x8xf32>
    %39 = vector.multi_reduction <add>, %38, %cst_14 [2] : vector<2x8x8xf32> to vector<2x8xf32>
    %40 = vector.shape_cast %39 : vector<2x8xf32> to vector<2x8x1xf32>
    %41 = tpu.reciprocal %40 {approx = true} : vector<2x8x1xf32> -> vector<2x8x1xf32>
    %42 = vector.broadcast %41 : vector<2x8x1xf32> to vector<2x8x8xf32>
    %43 = arith.mulf %38, %42 : vector<2x8x8xf32>
    %44 = vector.shape_cast %29 : vector<1x32xf32> to vector<1x1x32xf32>
    %45 = vector.broadcast %44 : vector<1x1x32xf32> to vector<2x8x32xf32>
    %46 = arith.mulf %20, %45 : vector<2x8x32xf32>
    "tpu.trace_start"() <{level = 10 : i32, message = "bqk,bkd->bqd"}> : () -> ()
    %cst_15 = arith.constant dense<0.000000e+00> : vector<2x8x32xf32>
    %47 = tpu.matmul %43, %46, %cst_15 {dimension_numbers = #tpu.dot_dimension_numbers<[2], [1], [1], [2], [0, 0, 0, 1, 1, 2], [0], [0]>} : vector<2x8x8xf32>, vector<2x8x32xf32>, vector<2x8x32xf32> -> vector<2x8x32xf32>
    "tpu.trace_stop"() : () -> ()
    %48 = arith.addf %22, %47 : vector<2x8x32xf32>
    %c8_i32_16 = arith.constant 8 : i32
    %49 = vector.broadcast %c8_i32_16 : i32 to vector<1x32xi32>
    %50 = arith.cmpi sge, %21, %49 : vector<1x32xi32>
    %c16_i32 = arith.constant 16 : i32
    %51 = vector.broadcast %c16_i32 : i32 to vector<1x32xi32>
    %52 = arith.cmpi slt, %21, %51 : vector<1x32xi32>
    %53 = arith.andi %50, %52 : vector<1x32xi1>
    %54 = arith.extui %53 : vector<1x32xi1> to vector<1x32xi32>
    %55 = arith.sitofp %54 : vector<1x32xi32> to vector<1x32xf32>
    %56 = vector.shape_cast %55 : vector<1x32xf32> to vector<1x1x32xf32>
    %57 = vector.broadcast %56 : vector<1x1x32xf32> to vector<2x8x32xf32>
    %58 = arith.mulf %18, %57 : vector<2x8x32xf32>
    "tpu.trace_start"() <{level = 10 : i32, message = "bqd,bkd->bqk"}> : () -> ()
    %cst_17 = arith.constant dense<0.000000e+00> : vector<2x8x8xf32>
    %59 = tpu.matmul %58, %19, %cst_17 {dimension_numbers = #tpu.dot_dimension_numbers<[2], [2], [1], [1], [0, 0, 0, 1, 1, 1], [0], [0]>} : vector<2x8x32xf32>, vector<2x8x32xf32>, vector<2x8x8xf32> -> vector<2x8x8xf32>
    "tpu.trace_stop"() : () -> ()
    %cst_18 = arith.constant dense<0xFF800000> : vector<2x8xf32>
    %60 = vector.multi_reduction <maximumf>, %59, %cst_18 [2] : vector<2x8x8xf32> to vector<2x8xf32>
    %61 = vector.shape_cast %60 : vector<2x8xf32> to vector<2x8x1xf32>
    %62 = vector.broadcast %61 : vector<2x8x1xf32> to vector<2x8x8xf32>
    %63 = arith.subf %59, %62 : vector<2x8x8xf32>
    %64 = math.exp %63 : vector<2x8x8xf32>
    %cst_19 = arith.constant dense<0.000000e+00> : vector<2x8xf32>
    %65 = vector.multi_reduction <add>, %64, %cst_19 [2] : vector<2x8x8xf32> to vector<2x8xf32>
    %66 = vector.shape_cast %65 : vector<2x8xf32> to vector<2x8x1xf32>
    %67 = tpu.reciprocal %66 {approx = true} : vector<2x8x1xf32> -> vector<2x8x1xf32>
    %68 = vector.broadcast %67 : vector<2x8x1xf32> to vector<2x8x8xf32>
    %69 = arith.mulf %64, %68 : vector<2x8x8xf32>
    %70 = vector.shape_cast %55 : vector<1x32xf32> to vector<1x1x32xf32>
    %71 = vector.broadcast %70 : vector<1x1x32xf32> to vector<2x8x32xf32>
    %72 = arith.mulf %20, %71 : vector<2x8x32xf32>
    "tpu.trace_start"() <{level = 10 : i32, message = "bqk,bkd->bqd"}> : () -> ()
    %cst_20 = arith.constant dense<0.000000e+00> : vector<2x8x32xf32>
    %73 = tpu.matmul %69, %72, %cst_20 {dimension_numbers = #tpu.dot_dimension_numbers<[2], [1], [1], [2], [0, 0, 0, 1, 1, 2], [0], [0]>} : vector<2x8x8xf32>, vector<2x8x32xf32>, vector<2x8x32xf32> -> vector<2x8x32xf32>
    "tpu.trace_stop"() : () -> ()
    %74 = arith.addf %48, %73 : vector<2x8x32xf32>
    %c16_i32_21 = arith.constant 16 : i32
    %75 = vector.broadcast %c16_i32_21 : i32 to vector<1x32xi32>
    %76 = arith.cmpi sge, %21, %75 : vector<1x32xi32>
    %c24_i32 = arith.constant 24 : i32
    %77 = vector.broadcast %c24_i32 : i32 to vector<1x32xi32>
    %78 = arith.cmpi slt, %21, %77 : vector<1x32xi32>
    %79 = arith.andi %76, %78 : vector<1x32xi1>
    %80 = arith.extui %79 : vector<1x32xi1> to vector<1x32xi32>
    %81 = arith.sitofp %80 : vector<1x32xi32> to vector<1x32xf32>
    %82 = vector.shape_cast %81 : vector<1x32xf32> to vector<1x1x32xf32>
    %83 = vector.broadcast %82 : vector<1x1x32xf32> to vector<2x8x32xf32>
    %84 = arith.mulf %18, %83 : vector<2x8x32xf32>
    "tpu.trace_start"() <{level = 10 : i32, message = "bqd,bkd->bqk"}> : () -> ()
    %cst_22 = arith.constant dense<0.000000e+00> : vector<2x8x8xf32>
    %85 = tpu.matmul %84, %19, %cst_22 {dimension_numbers = #tpu.dot_dimension_numbers<[2], [2], [1], [1], [0, 0, 0, 1, 1, 1], [0], [0]>} : vector<2x8x32xf32>, vector<2x8x32xf32>, vector<2x8x8xf32> -> vector<2x8x8xf32>
    "tpu.trace_stop"() : () -> ()
    %cst_23 = arith.constant dense<0xFF800000> : vector<2x8xf32>
    %86 = vector.multi_reduction <maximumf>, %85, %cst_23 [2] : vector<2x8x8xf32> to vector<2x8xf32>
    %87 = vector.shape_cast %86 : vector<2x8xf32> to vector<2x8x1xf32>
    %88 = vector.broadcast %87 : vector<2x8x1xf32> to vector<2x8x8xf32>
    %89 = arith.subf %85, %88 : vector<2x8x8xf32>
    %90 = math.exp %89 : vector<2x8x8xf32>
    %cst_24 = arith.constant dense<0.000000e+00> : vector<2x8xf32>
    %91 = vector.multi_reduction <add>, %90, %cst_24 [2] : vector<2x8x8xf32> to vector<2x8xf32>
    %92 = vector.shape_cast %91 : vector<2x8xf32> to vector<2x8x1xf32>
    %93 = tpu.reciprocal %92 {approx = true} : vector<2x8x1xf32> -> vector<2x8x1xf32>
    %94 = vector.broadcast %93 : vector<2x8x1xf32> to vector<2x8x8xf32>
    %95 = arith.mulf %90, %94 : vector<2x8x8xf32>
    %96 = vector.shape_cast %81 : vector<1x32xf32> to vector<1x1x32xf32>
    %97 = vector.broadcast %96 : vector<1x1x32xf32> to vector<2x8x32xf32>
    %98 = arith.mulf %20, %97 : vector<2x8x32xf32>
    "tpu.trace_start"() <{level = 10 : i32, message = "bqk,bkd->bqd"}> : () -> ()
    %cst_25 = arith.constant dense<0.000000e+00> : vector<2x8x32xf32>
    %99 = tpu.matmul %95, %98, %cst_25 {dimension_numbers = #tpu.dot_dimension_numbers<[2], [1], [1], [2], [0, 0, 0, 1, 1, 2], [0], [0]>} : vector<2x8x8xf32>, vector<2x8x32xf32>, vector<2x8x32xf32> -> vector<2x8x32xf32>
    "tpu.trace_stop"() : () -> ()
    %100 = arith.addf %74, %99 : vector<2x8x32xf32>
    %c24_i32_26 = arith.constant 24 : i32
    %101 = vector.broadcast %c24_i32_26 : i32 to vector<1x32xi32>
    %102 = arith.cmpi sge, %21, %101 : vector<1x32xi32>
    %c32_i32 = arith.constant 32 : i32
    %103 = vector.broadcast %c32_i32 : i32 to vector<1x32xi32>
    %104 = arith.cmpi slt, %21, %103 : vector<1x32xi32>
    %105 = arith.andi %102, %104 : vector<1x32xi1>
    %106 = arith.extui %105 : vector<1x32xi1> to vector<1x32xi32>
    %107 = arith.sitofp %106 : vector<1x32xi32> to vector<1x32xf32>
    %108 = vector.shape_cast %107 : vector<1x32xf32> to vector<1x1x32xf32>
    %109 = vector.broadcast %108 : vector<1x1x32xf32> to vector<2x8x32xf32>
    %110 = arith.mulf %18, %109 : vector<2x8x32xf32>
    "tpu.trace_start"() <{level = 10 : i32, message = "bqd,bkd->bqk"}> : () -> ()
    %cst_27 = arith.constant dense<0.000000e+00> : vector<2x8x8xf32>
    %111 = tpu.matmul %110, %19, %cst_27 {dimension_numbers = #tpu.dot_dimension_numbers<[2], [2], [1], [1], [0, 0, 0, 1, 1, 1], [0], [0]>} : vector<2x8x32xf32>, vector<2x8x32xf32>, vector<2x8x8xf32> -> vector<2x8x8xf32>
    "tpu.trace_stop"() : () -> ()
    %cst_28 = arith.constant dense<0xFF800000> : vector<2x8xf32>
    %112 = vector.multi_reduction <maximumf>, %111, %cst_28 [2] : vector<2x8x8xf32> to vector<2x8xf32>
    %113 = vector.shape_cast %112 : vector<2x8xf32> to vector<2x8x1xf32>
    %114 = vector.broadcast %113 : vector<2x8x1xf32> to vector<2x8x8xf32>
    %115 = arith.subf %111, %114 : vector<2x8x8xf32>
    %116 = math.exp %115 : vector<2x8x8xf32>
    %cst_29 = arith.constant dense<0.000000e+00> : vector<2x8xf32>
    %117 = vector.multi_reduction <add>, %116, %cst_29 [2] : vector<2x8x8xf32> to vector<2x8xf32>
    %118 = vector.shape_cast %117 : vector<2x8xf32> to vector<2x8x1xf32>
    %119 = tpu.reciprocal %118 {approx = true} : vector<2x8x1xf32> -> vector<2x8x1xf32>
    %120 = vector.broadcast %119 : vector<2x8x1xf32> to vector<2x8x8xf32>
    %121 = arith.mulf %116, %120 : vector<2x8x8xf32>
    %122 = vector.shape_cast %107 : vector<1x32xf32> to vector<1x1x32xf32>
    %123 = vector.broadcast %122 : vector<1x1x32xf32> to vector<2x8x32xf32>
    %124 = arith.mulf %20, %123 : vector<2x8x32xf32>
    "tpu.trace_start"() <{level = 10 : i32, message = "bqk,bkd->bqd"}> : () -> ()
    %cst_30 = arith.constant dense<0.000000e+00> : vector<2x8x32xf32>
    %125 = tpu.matmul %121, %124, %cst_30 {dimension_numbers = #tpu.dot_dimension_numbers<[2], [1], [1], [2], [0, 0, 0, 1, 1, 2], [0], [0]>} : vector<2x8x8xf32>, vector<2x8x32xf32>, vector<2x8x32xf32> -> vector<2x8x32xf32>
    "tpu.trace_stop"() : () -> ()
    %126 = arith.addf %100, %125 : vector<2x8x32xf32>
    %127 = vector.shape_cast %126 : vector<2x8x32xf32> to vector<16x32xf32>
    %c0_31 = arith.constant 0 : index
    %c0_32 = arith.constant 0 : index
    %c0_33 = arith.constant 0 : index
    %128 = vector.load %arg4[%c0_31, %c0_32, %c0_33] : memref<1x32x32xf32, #tpu.memory_space<vmem>>, vector<1x32x32xf32>
    %129 = vector.shape_cast %128 : vector<1x32x32xf32> to vector<32x32xf32>
    %cst_34 = arith.constant dense<0.000000e+00> : vector<16x32xf32>
    %130 = tpu.matmul %127, %129, %cst_34 {dimension_numbers = #tpu.dot_dimension_numbers<[1], [0], [0], [1], [0, 0, 1, 1], [], []>} : vector<16x32xf32>, vector<32x32xf32>, vector<16x32xf32> -> vector<16x32xf32>
    %c0_35 = arith.constant 0 : index
    %c0_36 = arith.constant 0 : index
    %c0_37 = arith.constant 0 : index
    %131 = vector.load %arg5[%c0_35, %c0_36, %c0_37] : memref<1x1x32xf32, #tpu.memory_space<vmem>>, vector<1x1x32xf32>
    %132 = vector.shape_cast %131 : vector<1x1x32xf32> to vector<1x32xf32>
    %133 = vector.broadcast %132 : vector<1x32xf32> to vector<16x32xf32>
    %134 = arith.addf %130, %133 : vector<16x32xf32>
    %135 = arith.addf %3, %134 : vector<16x32xf32>
    %c0_38 = arith.constant 0 : index
    %c0_39 = arith.constant 0 : index
    %c0_40 = arith.constant 0 : index
    %136 = vector.load %arg8[%c0_38, %c0_39, %c0_40] : memref<1x1x32xf32, #tpu.memory_space<vmem>>, vector<1x1x32xf32>
    %137 = vector.shape_cast %136 : vector<1x1x32xf32> to vector<1x32xf32>
    %c0_41 = arith.constant 0 : index
    %c0_42 = arith.constant 0 : index
    %c0_43 = arith.constant 0 : index
    %138 = vector.load %arg9[%c0_41, %c0_42, %c0_43] : memref<1x1x32xf32, #tpu.memory_space<vmem>>, vector<1x1x32xf32>
    %139 = vector.shape_cast %138 : vector<1x1x32xf32> to vector<1x32xf32>
    %cst_44 = arith.constant dense<0.000000e+00> : vector<16xf32>
    %140 = vector.multi_reduction <add>, %135, %cst_44 [1] : vector<16x32xf32> to vector<16xf32>
    %141 = vector.shape_cast %140 : vector<16xf32> to vector<16x1xf32>
    %cst_45 = arith.constant 3.200000e+01 : f32
    %142 = vector.broadcast %cst_45 : f32 to vector<16x1xf32>
    %143 = arith.divf %141, %142 : vector<16x1xf32>
    %144 = vector.broadcast %143 : vector<16x1xf32> to vector<16x32xf32>
    %145 = arith.subf %135, %144 : vector<16x32xf32>
    %146 = arith.mulf %145, %145 : vector<16x32xf32>
    %cst_46 = arith.constant dense<0.000000e+00> : vector<16xf32>
    %147 = vector.multi_reduction <add>, %146, %cst_46 [1] : vector<16x32xf32> to vector<16xf32>
    %148 = vector.shape_cast %147 : vector<16xf32> to vector<16x1xf32>
    %cst_47 = arith.constant 3.200000e+01 : f32
    %149 = vector.broadcast %cst_47 : f32 to vector<16x1xf32>
    %150 = arith.divf %148, %149 : vector<16x1xf32>
    %cst_48 = arith.constant 9.99999997E-7 : f32
    %151 = vector.broadcast %cst_48 : f32 to vector<16x1xf32>
    %152 = arith.addf %150, %151 : vector<16x1xf32>
    %153 = math.rsqrt %152 : vector<16x1xf32>
    %154 = vector.broadcast %153 : vector<16x1xf32> to vector<16x32xf32>
    %155 = arith.mulf %145, %154 : vector<16x32xf32>
    %156 = vector.broadcast %137 : vector<1x32xf32> to vector<16x32xf32>
    %157 = arith.mulf %155, %156 : vector<16x32xf32>
    %158 = vector.broadcast %139 : vector<1x32xf32> to vector<16x32xf32>
    %159 = arith.addf %157, %158 : vector<16x32xf32>
    %c0_49 = arith.constant 0 : index
    %c0_50 = arith.constant 0 : index
    %c0_51 = arith.constant 0 : index
    %160 = vector.load %arg6[%c0_49, %c0_50, %c0_51] : memref<1x32x32xf32, #tpu.memory_space<vmem>>, vector<1x32x32xf32>
    %161 = vector.shape_cast %160 : vector<1x32x32xf32> to vector<32x32xf32>
    %cst_52 = arith.constant dense<0.000000e+00> : vector<16x32xf32>
    %162 = tpu.matmul %159, %161, %cst_52 {dimension_numbers = #tpu.dot_dimension_numbers<[1], [0], [0], [1], [0, 0, 1, 1], [], []>} : vector<16x32xf32>, vector<32x32xf32>, vector<16x32xf32> -> vector<16x32xf32>
    %c0_53 = arith.constant 0 : index
    %c0_54 = arith.constant 0 : index
    %c0_55 = arith.constant 0 : index
    %163 = vector.load %arg7[%c0_53, %c0_54, %c0_55] : memref<1x1x32xf32, #tpu.memory_space<vmem>>, vector<1x1x32xf32>
    %164 = vector.shape_cast %163 : vector<1x1x32xf32> to vector<1x32xf32>
    %165 = vector.broadcast %164 : vector<1x32xf32> to vector<16x32xf32>
    %166 = arith.addf %162, %165 : vector<16x32xf32>
    %167 = arith.addf %166, %159 : vector<16x32xf32>
    %c0_56 = arith.constant 0 : index
    %c0_57 = arith.constant 0 : index
    %c0_58 = arith.constant 0 : index
    %168 = vector.load %arg10[%c0_56, %c0_57, %c0_58] : memref<1x1x32xf32, #tpu.memory_space<vmem>>, vector<1x1x32xf32>
    %169 = vector.shape_cast %168 : vector<1x1x32xf32> to vector<1x32xf32>
    %c0_59 = arith.constant 0 : index
    %c0_60 = arith.constant 0 : index
    %c0_61 = arith.constant 0 : index
    %170 = vector.load %arg11[%c0_59, %c0_60, %c0_61] : memref<1x1x32xf32, #tpu.memory_space<vmem>>, vector<1x1x32xf32>
    %171 = vector.shape_cast %170 : vector<1x1x32xf32> to vector<1x32xf32>
    %cst_62 = arith.constant dense<0.000000e+00> : vector<16xf32>
    %172 = vector.multi_reduction <add>, %167, %cst_62 [1] : vector<16x32xf32> to vector<16xf32>
    %173 = vector.shape_cast %172 : vector<16xf32> to vector<16x1xf32>
    %cst_63 = arith.constant 3.200000e+01 : f32
    %174 = vector.broadcast %cst_63 : f32 to vector<16x1xf32>
    %175 = arith.divf %173, %174 : vector<16x1xf32>
    %176 = vector.broadcast %175 : vector<16x1xf32> to vector<16x32xf32>
    %177 = arith.subf %167, %176 : vector<16x32xf32>
    %178 = arith.mulf %177, %177 : vector<16x32xf32>
    %cst_64 = arith.constant dense<0.000000e+00> : vector<16xf32>
    %179 = vector.multi_reduction <add>, %178, %cst_64 [1] : vector<16x32xf32> to vector<16xf32>
    %180 = vector.shape_cast %179 : vector<16xf32> to vector<16x1xf32>
    %cst_65 = arith.constant 3.200000e+01 : f32
    %181 = vector.broadcast %cst_65 : f32 to vector<16x1xf32>
    %182 = arith.divf %180, %181 : vector<16x1xf32>
    %cst_66 = arith.constant 9.99999997E-7 : f32
    %183 = vector.broadcast %cst_66 : f32 to vector<16x1xf32>
    %184 = arith.addf %182, %183 : vector<16x1xf32>
    %185 = math.rsqrt %184 : vector<16x1xf32>
    %186 = vector.broadcast %185 : vector<16x1xf32> to vector<16x32xf32>
    %187 = arith.mulf %177, %186 : vector<16x32xf32>
    %188 = vector.broadcast %169 : vector<1x32xf32> to vector<16x32xf32>
    %189 = arith.mulf %187, %188 : vector<16x32xf32>
    %190 = vector.broadcast %171 : vector<1x32xf32> to vector<16x32xf32>
    %191 = arith.addf %189, %190 : vector<16x32xf32>
    %c0_67 = arith.constant 0 : index
    %c0_68 = arith.constant 0 : index
    %192 = vector.load %arg13[%c0_67, %c0_68] : memref<16x32xf32, #tpu.memory_space<vmem>>, vector<16x32xf32>
    tpu.vector_store %arg13[%c0_67, %c0_68], %191 {strides = array<i32>} : memref<16x32xf32, #tpu.memory_space<vmem>>, vector<16x32xf32>,
    %c1_i32 = arith.constant 1 : i32
    %193 = arith.cmpi eq, %arg0, %c1_i32 : i32
    %194 = arith.extui %193 : i1 to i32
    %c0_i32_69 = arith.constant 0 : i32
    %195 = arith.cmpi ne, %194, %c0_i32_69 : i32
    scf.if %195 {
      %c0_70 = arith.constant 0 : index
      %c0_71 = arith.constant 0 : index
      %196 = vector.load %arg12[%c0_70, %c0_71] : memref<16x32xf32, #tpu.memory_space<vmem>>, vector<16x32xf32>
      tpu.vector_store %arg12[%c0_70, %c0_71], %191 {strides = array<i32>} : memref<16x32xf32, #tpu.memory_space<vmem>>, vector<16x32xf32>,
    } else {
    }
    return
  }
  func.func @transform_0(%arg0: i32) -> (i32, i32) {
    %c0_i32 = arith.constant 0 : i32
    %c0_i32_0 = arith.constant 0 : i32
    %c0_i32_1 = arith.constant 0 : i32
    return %c0_i32, %c0_i32_0 : i32, i32
  }
  func.func @transform_1(%arg0: i32) -> (i32, i32, i32) {
    %c0_i32 = arith.constant 0 : i32
    %c0_i32_0 = arith.constant 0 : i32
    %c0_i32_1 = arith.constant 0 : i32
    return %arg0, %c0_i32, %c0_i32_0 : i32, i32, i32
  }
  func.func @transform_2(%arg0: i32) -> (i32, i32, i32) {
    %c0_i32 = arith.constant 0 : i32
    %c0_i32_0 = arith.constant 0 : i32
    %c0_i32_1 = arith.constant 0 : i32
    return %arg0, %c0_i32, %c0_i32_0 : i32, i32, i32
  }
  func.func @transform_3(%arg0: i32) -> (i32, i32, i32) {
    %c0_i32 = arith.constant 0 : i32
    %c0_i32_0 = arith.constant 0 : i32
    %c0_i32_1 = arith.constant 0 : i32
    return %arg0, %c0_i32, %c0_i32_0 : i32, i32, i32
  }
  func.func @transform_4(%arg0: i32) -> (i32, i32, i32) {
    %c0_i32 = arith.constant 0 : i32
    %c0_i32_0 = arith.constant 0 : i32
    %c0_i32_1 = arith.constant 0 : i32
    return %arg0, %c0_i32, %c0_i32_0 : i32, i32, i32
  }
  func.func @transform_5(%arg0: i32) -> (i32, i32, i32) {
    %c0_i32 = arith.constant 0 : i32
    %c0_i32_0 = arith.constant 0 : i32
    %c0_i32_1 = arith.constant 0 : i32
    return %arg0, %c0_i32, %c0_i32_0 : i32, i32, i32
  }
  func.func @transform_6(%arg0: i32) -> (i32, i32, i32) {
    %c0_i32 = arith.constant 0 : i32
    %c0_i32_0 = arith.constant 0 : i32
    %c0_i32_1 = arith.constant 0 : i32
    return %arg0, %c0_i32, %c0_i32_0 : i32, i32, i32
  }
  func.func @transform_7(%arg0: i32) -> (i32, i32, i32) {
    %c0_i32 = arith.constant 0 : i32
    %c0_i32_0 = arith.constant 0 : i32
    %c0_i32_1 = arith.constant 0 : i32
    return %arg0, %c0_i32, %c0_i32_0 : i32, i32, i32
  }
  func.func @transform_8(%arg0: i32) -> (i32, i32, i32) {
    %c0_i32 = arith.constant 0 : i32
    %c0_i32_0 = arith.constant 0 : i32
    %c0_i32_1 = arith.constant 0 : i32
    return %arg0, %c0_i32, %c0_i32_0 : i32, i32, i32
  }
  func.func @transform_9(%arg0: i32) -> (i32, i32, i32) {
    %c0_i32 = arith.constant 0 : i32
    %c0_i32_0 = arith.constant 0 : i32
    %c0_i32_1 = arith.constant 0 : i32
    return %arg0, %c0_i32, %c0_i32_0 : i32, i32, i32
  }
  func.func @transform_10(%arg0: i32) -> (i32, i32, i32) {
    %c0_i32 = arith.constant 0 : i32
    %c0_i32_0 = arith.constant 0 : i32
    %c0_i32_1 = arith.constant 0 : i32
    return %arg0, %c0_i32, %c0_i32_0 : i32, i32, i32
  }
  func.func @transform_11(%arg0: i32) -> (i32, i32) {
    %c0_i32 = arith.constant 0 : i32
    %c0_i32_0 = arith.constant 0 : i32
    %c0_i32_1 = arith.constant 0 : i32
    return %c0_i32, %c0_i32_0 : i32, i32
  }
}

</mosaic_0001>

<bundles_post_ra>
// kernel: tpu_custom_call.1
= control target key start
LH: loop header
LB: loop body
LE: loop exit
PB: predicated region body
PF: predicated region fallthrough
CT: control target
= control target key end

     0   :  { %s3681_s0 = inlined_call_operand.hbm [shape: f32[16,32], index: 0, kind: input, shape index: {}]   ;;  %s3682_s1 = inlined_call_operand.hbm [shape: f32[2,32,96], index: 1, kind: input, shape index: {}]   ;;  %s3683_s2 = inlined_call_operand.vmem [shape: f32[2,1,96], index: 2, kind: input, shape index: {}]   ;;  %s3684_s3 = inlined_call_operand.hbm [shape: f32[2,32,32], index: 3, kind: input, shape index: {}]   ;;  %s3685_s4 = inlined_call_operand.vmem [shape: f32[2,1,32], index: 4, kind: input, shape index: {}]   ;;  %s3686_s5 = inlined_call_operand.hbm [shape: f32[2,32,32], index: 5, kind: input, shape index: {}]   ;;  %s3687_s6 = inlined_call_operand.vmem [shape: f32[2,1,32], index: 6, kind: input, shape index: {}]   ;;  %s3688_s7 = inlined_call_operand.vmem [shape: f32[2,1,32], index: 7, kind: input, shape index: {}]   ;;  %s3689_s8 = inlined_call_operand.vmem [shape: f32[2,1,32], index: 8, kind: input, shape index: {}]   ;;  %s3690_s9 = inlined_call_operand.vmem [shape: f32[2,1,32], index: 9, kind: input, shape index: {}]   ;;  %s3691_s10 = inlined_call_operand.vmem [shape: f32[2,1,32], index: 10, kind: input, shape index: {}]   ;;  %s3692_s11 = inlined_call_operand.hbm [shape: f32[16,32], index: 11, kind: output, shape index: {}]  }
   0x1   :  { %3708 = sst [smem:[#allocation18_spill]] %s3681_s0 }
   0x2   :  { %3709 = sst [smem:[#allocation19_spill]] %s3682_s1 }
   0x3   :  { %3710 = sst [smem:[#allocation20_spill]] %s3684_s3 }
   0x4   :  { %3711 = sst [smem:[#allocation21_spill]] %s3691_s10 }
   0x5   :  { %3712 = sst [smem:[#allocation22_spill]] %s3692_s11 }
   0x6   :  { %16 = vsyncpa [#allocation4], 0 }
   0x7   :  { %17 = vsyncpa [#allocation7], 0 }
   0x8   :  { %19 = vsyncpa [#allocation7 + $0x1], 0 }
   0x9   :  { %20 = vsyncpa [#allocation10], 0 }
   0xa   :  { %22 = vsyncpa [#allocation10 + $0x1], 0 }
   0xb   :  { %23 = vsyncpa [#allocation5], 0  ;;  %s3155_s17 = smov 0   ;;  %s3157_s18 = smov 0  }
   0xc   :  { %s3159_s19 = smov 0   ;;  %s3161_s20 = smov 0  }
   0xd LB: > { %s3176_s21 = sadd.s32 1, %s3080_s20   ;;  %s57_s22 = sadd.s32 1, %s3076_s19  ;;  %s3080_s20 = sphi %s3161_s20, %s3738_s20   ;;  %s3076_s19 = sphi %s3159_s19, %s3742_s19   ;;  %s3072_s18 = sphi %s3157_s18, %s3741_s18   ;;  %s3068_s17 = sphi %s3155_s17, %s3740_s17  }
   0xe   : > { %3713 = sst [smem:[#allocation16_spill]] %s3176_s21  ;;  %s54_s23 = ssub.s32 %s3080_s20, %s3176_s21 }
   0xf   : > { %p64_p0 = scmp.ne.s32.totalorder %s3076_s19, %s3072_s18  ;;  %p55_p1 = scmp.eq.s32.totalorder %s54_s23, 0 }
  0x10   : > { %p65_p2 = scmp.eq.s32.totalorder %s3080_s20, 0  ;;  %p2804_p4 = scmp.lt.s32.totalorder %s3080_s20, 2 }
  0x11   : > { %s3185_s24 = scalar_select %p55_p1, %s3076_s19, %s57_s22  }
  0x12   : > { %p66_p3 = por %p65_p2, %p64_p0  ;;  %s362_s25 = sand.u32 1, %s3080_s20  }
  0x13   : > { %3714 = sst [smem:[#allocation17_spill]] %s3185_s24  ;;  %s3693_s26 = sand.u32 1, %s3076_s19  }
  0x14   : > { %s3192_s27 = sshll.u32 %s3693_s26, 5  ;;  %s3195_s28 = sshll.u32 %s3080_s20, 9 }
  0x15   : > { %s3715_s1 = sld [smem:[#allocation19_spill]]  ;;  %s366_s13 = scalar_lea.vmem [#allocation6], %s3192_s27 }
  0x16   : > { %s373_s14 = sshll.u32 %s366_s13, 4  ;;  %p3204_p5 = pnand %p2804_p4, %p66_p3  ;;  %s3208_s14 = int_to_ptr.vmem [resolvable:$true] %s373_s14 }
  0x17   : > { %s3210_s16 = scalar_lea.sflag [#allocation7], %s362_s25 }
  0x18   : > { %s3716_s15 = scalar_select %p3204_p5, 1, 0 }
  0x19   : > { %p3216_p7 = pneg %p3204_p5 }
  0x1b   : > { %s3201_s12 = scalar_lea.hbm %s3715_s1, %s3195_s28  ;;  %s2895_s13 = scalar_lea.hbm %s3715_s1, 1024 }
  0x1c   : > { %s2890_s22 = scalar_lea.hbm %s3201_s12, 512  ;;  %p2896_p10 = scmp.lt.u32.totalorder %s3201_s12, %s3715_s1 }
  0x1d   : > { %p2891_p6 = scmp.ne.s32.totalorder %s3201_s12, %s2890_s22  ;;  %p2897_p11 = scmp.lt.u32.totalorder %s2895_s13, %s2890_s22 }
  0x1e   : > { %s3717_s23 = scalar_select %p3216_p7, 1, 0 }
  0x1f   : > { %p2893_p8 = pnand %p3216_p7, %p2891_p6  ;;  %p2898_p12 = por %p2897_p11, %p2896_p10 }
  0x20   : > { %p2899_p13 = scmp.lt.u32.totalorder %s2890_s22, %s3201_s12 }
  0x21   : > { %p2894_p9 = pneg %p2893_p8 }
  0x22   : > { %p2900_p0 = por %p2899_p13, %p2898_p12 }
  0x24   : > { %p2901_p1 = pnand %p2900_p0, %p2894_p9 }
  0x26   : > { %2904 = shalt.err (!%p2901_p1)
}
  0x27   : > { %s2905_s25 = scalar_lea.vmem %s3208_s14, 512  ;;  %s3082_s29 = smov [#allocation6]  }
  0x28   : > { %p2906_p2 = scmp.ne.s32.totalorder %s3208_s14, %s2905_s25  ;;  %s2910_s30 = sshll.u32 %s3082_s29, 4  ;;  %s2911_s30 = int_to_ptr.vmem [resolvable:$false] %s2910_s30 }
  0x29   : > { %s2912_s24 = scalar_lea.vmem %s2911_s30, 1024  ;;  %p2913_p6 = scmp.lt.s32.totalorder %s3208_s14, %s2911_s30 }
  0x2a   : > { %p2908_p3 = pnand %p2906_p2, %p3216_p7  ;;  %p2914_p8 = scmp.lt.s32.totalorder %s2912_s24, %s2905_s25 }
  0x2c   : > { %p2909_p4 = pneg %p2908_p3  ;;  %p2915_p10 = por %p2914_p8, %p2913_p6 }
  0x2e   : > { %p2916_p11 = pnand %p2915_p10, %p2909_p4 }
  0x30   : > { %2919 = shalt.err (!%p2916_p11)
}
  0x31   : > { %s3694_s26 = smov 128   ;;  %s3696_s22 = smov 8  }
  0x32   : > { %2796 = dma.hbm_to_vmem [thread:$0]  (!%p3204_p5), %s3201_s12, 512, %s3208_s14, %s3210_s16, %s3694_s26, %s3694_s26, %s3696_s22  }
  0x33   : > { %s3244_s13 = sadd.s32 4294967295, %s3080_s20   ;;  %p70_p9 = scmp.ne.s32.totalorder %s3072_s18, %s3068_s17 }
  0x34   : > { %p3701_p12 = scmp.eq.s32.totalorder %s3244_s13, 0  ;;  %p2509_p13 = scmp.ge.s32.totalorder %s3080_s20, 1 }
  0x35   : > { %p336_p0 = scmp.lt.s32.totalorder %s3080_s20, 3  ;;  %s3085_s12 = smov [#allocation3]  }
  0x36   : > { %p3254_p2 = por %p3701_p12, %p70_p9  ;;  %s348_s14 = sshll.u32 %s3085_s12, 4  ;;  %s3262_s14 = int_to_ptr.vmem [resolvable:$true] %s348_s14 }
  0x37   : > { %p3258_p3 = pnand %p2509_p13, %p336_p0  ;;  %s3720_s3 = sld [smem:[#allocation20_spill]] }
  0x38   : > { %s3718_s25 = scalar_select %p3254_p2, 1, 0 }
  0x39   : > { %s3719_s29 = scalar_select %p3258_p3, 1, 0 }
  0x3a   : > { %p2789_p4 = pneg %p3258_p3  ;;  %s393_s24 = scalar_lea.vmem [#allocation8], %s3192_s27 }
  0x3b   : > { %s400_s26 = sshll.u32 %s393_s24, 4  ;;  %s3279_s26 = int_to_ptr.vmem [resolvable:$true] %s400_s26 }
  0x3c   : > { %p3275_p6 = pnand %p2789_p4, %p3701_p12 }
  0x3d   : > { %s3270_s20 = scalar_lea.hbm %s3720_s3, %s3195_s28  ;;  %s2925_s1 = scalar_lea.hbm %s3720_s3, 1024 }
  0x3e   : > { %s3721_s22 = scalar_select %p3275_p6, 1, 0 }
  0x3f   : > { %s2920_s12 = scalar_lea.hbm %s3270_s20, 512  ;;  %p2926_p9 = scmp.lt.u32.totalorder %s3270_s20, %s3720_s3 }
  0x40   : > { %p2921_p8 = scmp.ne.s32.totalorder %s3270_s20, %s2920_s12  ;;  %p2927_p13 = scmp.lt.u32.totalorder %s2925_s1, %s2920_s12 }
  0x41   : > { %p2929_p4 = scmp.lt.u32.totalorder %s2920_s12, %s3270_s20 }
  0x42   : > { %p2923_p10 = pnand %p2921_p8, %p3216_p7  ;;  %p2928_p0 = por %p2927_p13, %p2926_p9 }
  0x44   : > { %p2924_p11 = pneg %p2923_p10  ;;  %p2930_p1 = por %p2929_p4, %p2928_p0 }
  0x46   : > { %p2931_p12 = pnand %p2930_p1, %p2924_p11 }
  0x48   : > { %2934 = shalt.err (!%p2931_p12)
}
  0x49   : > { %s2935_s24 = scalar_lea.vmem %s3279_s26, 512  ;;  %s3086_s17 = smov [#allocation8]  }
  0x4a   : > { %p2936_p8 = scmp.ne.s32.totalorder %s3279_s26, %s2935_s24  ;;  %s2940_s30 = sshll.u32 %s3086_s17, 4  ;;  %s2941_s30 = int_to_ptr.vmem [resolvable:$false] %s2940_s30 }
  0x4b   : > { %s2942_s11 = scalar_lea.vmem %s2941_s30, 1024  ;;  %p2943_p3 = scmp.lt.s32.totalorder %s3279_s26, %s2941_s30 }
  0x4c   : > { %p2938_p10 = pnand %p2936_p8, %p3216_p7  ;;  %p2944_p6 = scmp.lt.s32.totalorder %s2942_s11, %s2935_s24 }
  0x4e   : > { %p2939_p2 = pneg %p2938_p10  ;;  %p2945_p9 = por %p2944_p6, %p2943_p3 }
  0x50   : > { %p2946_p13 = pnand %p2945_p9, %p2939_p2 }
  0x52   : > { %2949 = shalt.err (!%p2946_p13)
}
  0x53   : > { %s3722_s1 = smov 8   ;;  %s3723_s21 = smov 128  }
  0x54   : > { %2799 = dma.hbm_to_vmem [thread:$0]  (!%p3204_p5), %s3270_s20, 512, %s3279_s26, %s3210_s16, %s3723_s21, %s3723_s21, %s3722_s1  }
  0x55   : > { %s3724_s0 = sld [smem:[#allocation18_spill]]  ;;  %p3725_p1 = scmp.ne.s32.totalorder %s3721_s22, 0 }
  0x57   : > { %p2952_p2 = pneg %p3725_p1 }
  0x5b   : > { %s2950_s17 = scalar_lea.hbm %s3724_s0, 256 }
  0x5c   : > { %p2951_p12 = scmp.ne.s32.totalorder %s3724_s0, %s2950_s17  ;;  %p2957_p11 = scmp.lt.u32.totalorder %s2950_s17, %s3724_s0 }
  0x5e   : > { %p2953_p3 = pnand %p2952_p2, %p2951_p12 }
  0x60   : > { %p2954_p6 = pneg %p2953_p3 }
  0x62   : > { %p2959_p0 = pnand %p2957_p11, %p2954_p6 }
  0x64   : > { %2962 = shalt.err (!%p2959_p0)
}
  0x65   : > { %s2963_s16 = scalar_lea.vmem %s3262_s14, 256  ;;  %p2971_p9 = scmp.lt.s32.totalorder %s3262_s14, %s3262_s14 }
  0x66   : > { %p2964_p4 = scmp.ne.s32.totalorder %s3262_s14, %s2963_s16  ;;  %p2972_p13 = scmp.lt.s32.totalorder %s2963_s16, %s2963_s16 }
  0x68   : > { %p2966_p8 = pnand %p2964_p4, %p2952_p2  ;;  %p2973_p5 = por %p2972_p13, %p2971_p9 }
  0x6a   : > { %p2967_p10 = pneg %p2966_p8 }
  0x6c   : > { %p2974_p7 = pnand %p2973_p5, %p2967_p10 }
  0x6e   : > { %2977 = shalt.err (!%p2974_p7)
}
  0x6f   : > { %2792 = dma.hbm_to_vmem [thread:$0]  (!%p3725_p1), %s3724_s0, 256, %s3262_s14, [#allocation4], %s3723_s21, %s3723_s21, %s3722_s1  }
  0x70   : > { %s3334_s12 = scalar_lea.hbm %s3686_s5, %s3195_s28  ;;  %s420_s22 = scalar_lea.vmem [#allocation9], %s3192_s27 }
  0x71   : > { %s427_s17 = sshll.u32 %s420_s22, 4  ;;  %s3726_s30 = sand.u32 1, %s3076_s19   ;;  %s3337_s17 = int_to_ptr.vmem [resolvable:$true] %s427_s17 }
  0x72   : > { %s3341_s24 = scalar_lea.sflag [#allocation10], %s3726_s30  ;;  %s2978_s11 = scalar_lea.hbm %s3334_s12, 512 }
  0x73   : > { %p2979_p5 = scmp.ne.s32.totalorder %s3334_s12, %s2978_s11  ;;  %p3727_p7 = scmp.ne.s32.totalorder %s3717_s23, 0 }
  0x74   : > { %s2983_s28 = scalar_lea.hbm %s3686_s5, 1024  ;;  %p2984_p2 = scmp.lt.u32.totalorder %s3334_s12, %s3686_s5 }
  0x75   : > { %p2981_p12 = pnand %p2979_p5, %p3727_p7  ;;  %p2985_p3 = scmp.lt.u32.totalorder %s2983_s28, %s2978_s11 }
  0x76   : > { %p2987_p11 = scmp.lt.u32.totalorder %s2978_s11, %s3334_s12 }
  0x77   : > { %p2982_p1 = pneg %p2981_p12  ;;  %p2986_p6 = por %p2985_p3, %p2984_p2 }
  0x79   : > { %p2988_p0 = por %p2987_p11, %p2986_p6 }
  0x7b   : > { %p2989_p4 = pnand %p2988_p0, %p2982_p1 }
  0x7d   : > { %2992 = shalt.err (!%p2989_p4)
}
  0x7e   : > { %s2993_s27 = scalar_lea.vmem %s3337_s17, 512  ;;  %s3087_s26 = smov [#allocation9]  }
  0x7f   : > { %p2994_p8 = scmp.ne.s32.totalorder %s3337_s17, %s2993_s27  ;;  %s2998_s20 = sshll.u32 %s3087_s26, 4  ;;  %s2999_s20 = int_to_ptr.vmem [resolvable:$false] %s2998_s20 }
  0x80   : > { %s3000_s22 = scalar_lea.vmem %s2999_s20, 1024  ;;  %p3001_p13 = scmp.lt.s32.totalorder %s3337_s17, %s2999_s20 }
  0x81   : > { %p2996_p10 = pnand %p2994_p8, %p3727_p7  ;;  %p3002_p5 = scmp.lt.s32.totalorder %s3000_s22, %s2993_s27 }
  0x83   : > { %p2997_p9 = pneg %p2996_p10  ;;  %p3003_p12 = por %p3002_p5, %p3001_p13 }
  0x85   : > { %p3004_p2 = pnand %p3003_p12, %p2997_p9 }
  0x87   : > { %3007 = shalt.err (!%p3004_p2)
}
  0x88   : > { %p3728_p1 = scmp.ne.s32.totalorder %s3716_s15, 0  ;;  %p3729_p7 = scmp.ne.s32.totalorder %s3719_s29, 0 }
  0x89   : > { %p3730_p3 = scmp.eq.s32.totalorder (!%p3729_p7), %s3244_s13, 0 }
  0x8a   : > { %2802 = dma.hbm_to_vmem [thread:$0]  (!%p3728_p1), %s3334_s12, 512, %s3337_s17, %s3341_s24, %s3723_s21, %s3723_s21, %s3722_s1  }
  0x8b   : > { %469 = sbr.rel (%p3729_p7) target bundleno = 3462 (0xd86), region = 64 }
  0x92   : > { %3051 = dma.done.wait (%p3730_p3), [#allocation4], 256   ;;  %p3731_p6 = pmov %p3730_p3 }
  0x93   : > { %s475_s15 = sand.u32 1, %s3244_s13   ;;  %s477_s23 = sand.u32 1, %s3072_s18  }
  0x94   : > { %3053 = vsyncadd (%p3731_p6), [#allocation4], 4294967040  ;;  %s2523_s30 = sshll.u32 %s477_s23, 5  ;;  %s476_s11 = scalar_lea.sflag [#allocation7], %s475_s15 }
  0x95   : > { %s479_s14 = scalar_lea.vmem [#allocation6], %s2523_s30  ;;  %p3732_p11 = scmp.ne.s32.totalorder %s3718_s25, 0 }
  0x97   : > { %3055 = dma.done.wait (%p3732_p11), %s476_s11, 1024  }
  0x98   : > { %3057 = vsyncadd (%p3732_p11), %s476_s11, 4294966272  ;;  %s3380_s29 = scalar_lea.vmem [#allocation8], %s2523_s30  ;;  %s494_s1 = scalar_lea.sflag [#allocation10], %s477_s23 }
  0x99   : > { %s3382_s21 = scalar_lea.vmem [#allocation9], %s2523_s30 }
  0x9a   : > { %3059 = dma.done.wait (%p3732_p11), %s494_s1, 512  }
  0x9b   : > { %3061 = vsyncadd (%p3732_p11), %s494_s1, 4294966784  ;;  %p562_p0 = scmp.lt.s32.totalorder %s3244_s13, 1  ;;  %s3733_s28 = sld [smem:[#allocation21_spill]] }
  0x9c   : > { %p3734_p4 = scmp.ne.s32.totalorder %s3244_s13, 0 }
  0x9d   : > { %s3390_s12 = scalar_select %p562_p0, %s3244_s13, 1 }
  0x9e   : > { %586 = sbr.rel (%p3734_p4) target bundleno = 165 (0xa5), region = 84  ;;  %v587_v0 = vld [vmem:[#allocation3] sm:$0xff] (!%p3734_p4)  ;;  %vm589_vm0 = vcmask (!%p3734_p4), 261120   ;;  %v588_v1 = vld [vmem:[#allocation3 + $0x8] sm:$0xff] (!%p3734_p4) }
  0x9f   : > { %s567_s25 = scalar_lea.vmem %s3685_s4, %s3390_s12  ;;  %s570_s26 = scalar_lea.vmem %s3687_s6, %s3390_s12  ;;  %590 = vst.msk [vmem:[#allocation2] sm:$0xff] (!%p3734_p4), %vm589_vm0, %v587_v0  ;;  %591 = vst.msk [vmem:[#allocation2 + $0x8] sm:$0xff] (!%p3734_p4), %vm589_vm0, %v588_v1 }
  0xa0   : > { %s573_s15 = scalar_lea.vmem %s3688_s7, %s3390_s12  ;;  %s576_s11 = scalar_lea.vmem %s3689_s8, %s3390_s12 }
  0xa1   : > { %s579_s24 = scalar_lea.vmem %s3690_s9, %s3390_s12  ;;  %s582_s3 = scalar_lea.vmem %s3733_s28, %s3390_s12 }
  0xa5 PF: > { %v594_v2 = vld [vmem:[%s479_s14] sm:$0xff]  ;;  %v595_v3 = vld [vmem:[%s479_s14 + $0x8] sm:$0xff]  ;;  %v596_v4 = vld [vmem:[%s479_s14 + $0x10] sm:$0xff]  ;;  %vm605_vm1 = vcmask 261120   ;;  %v3088_v10 = vmov 0.0   ;;  %vm3089_vm2 = vmmov 0   ;;  %s3735_s16 = scalar_lea.vmem %s3683_s2, %s3390_s12  ;;  %v689_v16 = vlaneseq }
  0xa6   : > { %v2739_v5 = vpack.c.bf16 %v595_v3, %v594_v2  ;;  %v597_v6 = vld [vmem:[%s479_s14 + $0x18] sm:$0xff]  ;;  %v3422_v7 = vld [vmem:[#allocation2] sm:$0xff]  ;;  %v3426_v9 = vld [vmem:[#allocation2 + $0x8] sm:$0xff]  ;;  %2637 = vmatprep.subr.mxu1 %v3088_v10  ;;  %2639 = vmatprep.mubr.msk.f32.mxu1 %vm3089_vm2, %v3088_v10  ;;  %s3090_s10 = smov 96   ;;  %vm854_vm7 = vcmask 64512   ;;  %s3091_s27 = smov 64  }
  0xa7   : > { %v2743_v8 = vpack.c.bf16 %v597_v6, %v596_v4  ;;  %2634 = vmatprep.mubr.msk.f32.mxu0 %vm605_vm1, %v3422_v7  ;;  %v2527_v11 = vld [vmem:[%s3735_s16] ss:$0 sm:$0xff]  ;;  %v3447_v17 = vand.u32 127, %v689_v16  ;;  %p2568_p8 = scmp.ne.s32.totalorder %s3244_s13, 1 }
  0xa8   : > { %2740 = vmatprep.subr.bf16.mxu0 %v2739_v5 }
  0xa9   : > { %2742 = vmatpush3.bf16.msra.mxu0 %v2739_v5  ;;  %vm883_vm3 = vcmp.ge.s32.totalorder %v3447_v17, 8  ;;  %vm884_vm4 = vcmp.lt.s32.totalorder %v3447_v17, 16  ;;  %vm692_vm5 = vcmp.lt.s32.totalorder %v3447_v17, 8  ;;  %vm1372_vm8 = vcmp.ge.s32.totalorder %v3447_v17, 16 }
  0xaa   : > { %2744 = vmatprep.subr.bf16.mxu0 %v2743_v8  ;;  %vm885_vm6 = vmand %vm883_vm3, %vm884_vm4  ;;  %v2530_v19 = vsel %vm692_vm5, 1.0, %v3088_v10  ;;  %vm1373_vm9 = vcmp.lt.s32.totalorder %v3447_v17, 24  ;;  %vm1709_vm11 = vcmp.ge.s32.totalorder %v3447_v17, 24  ;;  %vm1710_vm12 = vcmp.lt.s32.totalorder %v3447_v17, 32 }
  0xab   : > { %v2535_v20 = vsel %vm885_vm6, 1.0, %v3088_v10  ;;  %vm1374_vm10 = vmand %vm1372_vm8, %vm1373_vm9 }
  0xac   : > { %vm1711_vm13 = vmand %vm1709_vm11, %vm1710_vm12 }
  0xad   : > { %2746 = vmatpush3.bf16.msra.mxu0 %v2743_v8 }
  0xae   : > { %2647 = vmatprep.subr.mxu0 %v3088_v10 }
  0xb0   : > { %2635 = vmatmul.mubr.msk.f32.vlgmr.msra.gmra.mrb[0].mxu0 %vm605_vm1, %v3426_v9 }
  0xb1   : > { %2649 = vmatprep.mubr.msk.f32.mxu0 %vm3089_vm2, %v3088_v10 }
 0x183   : > { %v2636_v12 = vpop.f32.mrb[0].mxu0 }
 0x184   : > { %v678_v13 = vpop.f32.mrb[1].mxu0  ;;  %v3444_v15 = vadd.f32 %v2636_v12, %v2527_v11 }
 0x185   : > { %v3441_v14 = vadd.f32 %v2527_v11, %v678_v13 }
 0x186   : > { %v3464_v22 = vmul.f32 0.35355338, %v3444_v15 }
 0x187   : > { %699 = vrot.lane.b32.xlu0 %v3441_v14, %s3090_s10  ;;  %v3453_v18 = vmul.f32 0.35355338, %v3441_v14 }
 0x188   : > { %v697_v26 = vmul.f32 %v2530_v19, %v3464_v22  ;;  %v889_v27 = vmul.f32 %v2535_v20, %v3464_v22 }
 0x189   : > { %v696_v23 = vmul.f32 %v2530_v19, %v3453_v18  ;;  %v888_v24 = vmul.f32 %v2535_v20, %v3453_v18 }
 0x18b   : > { %777 = vrot.lane.b32.xlu0 %v3444_v15, %s3090_s10 }
 0x1f9   : > { %v3457_v21 = vpop.permute.xlu0 %699 }
 0x1fa   : > { %2638 = vmatpush3.xpose.msk.msra.mxu1 %vm605_vm1, %v3457_v21  ;;  %2648 = vmatpush3.xpose.msk.msra.mxu0 %vm605_vm1, %v3457_v21 }
 0x1fb   : > { %2642 = vmatprep.subr.mxu1 %v3088_v10  ;;  %2657 = vmatprep.subr.mxu0 %v3088_v10 }
 0x1fd   : > { %v3470_v25 = vpop.permute.xlu0 %777  ;;  %2640 = vmatmul.mubr.msk.f32.vlgmr.msra.gmra.mrb[0].mxu1 %vm605_vm1, %v696_v23  ;;  %2650 = vmatmul.mubr.msk.f32.vlgmr.msra.gmra.mrb[2].mxu0 %vm605_vm1, %v888_v24 }
 0x1fe   : > { %2643 = vmatpush3.xpose.msk.msra.mxu1 %vm605_vm1, %v3470_v25  ;;  %2644 = vmatprep.mubr.msk.f32.mxu1 %vm3089_vm2, %v3088_v10 }
 0x1ff   : > { %2652 = vmatprep.subr.mxu1 %v3088_v10  ;;  %2659 = vmatprep.mubr.msk.f32.mxu0 %vm3089_vm2, %v3088_v10 }
 0x201   : > { %2645 = vmatmul.mubr.msk.f32.vlgmr.msra.gmra.mrb[2].mxu1 %vm605_vm1, %v697_v26 }
 0x202   : > { %2653 = vmatpush3.xpose.msk.msra.mxu1 %vm605_vm1, %v3470_v25  ;;  %2654 = vmatprep.mubr.msk.f32.mxu1 %vm3089_vm2, %v3088_v10 }
 0x203   : > { %2662 = vmatprep.subr.mxu1 %v3088_v10 }
 0x205   : > { %2655 = vmatmul.mubr.msk.f32.vlgmr.msra.gmra.mrb[4].mxu1 %vm605_vm1, %v889_v27 }
 0x206   : > { %2664 = vmatprep.mubr.msk.f32.mxu1 %vm3089_vm2, %v3088_v10 }
 0x2d0   : > { %v772_v28 = vpop.f32.mrb[0].mxu1  ;;  %v959_v29 = vpop.f32.mrb[2].mxu0 }
 0x2d1   : > { %v2641_v30 = vpop.f32.mrb[1].mxu1  ;;  %v2651_v31 = vpop.f32.mrb[3].mxu0  ;;  %v1036_v32 = vsel %vm854_vm7, %v959_v29, -inf  ;;  %v855_v33 = vsel %vm854_vm7, %v772_v28, -inf }
 0x2d2   : > { %1037 = vmax.xlane.f32.xlu1 %v1036_v32  ;;  %856 = vmax.xlane.f32.xlu0 %v855_v33 }
 0x2d4   : > { %v850_v34 = vpop.f32.mrb[2].mxu1 }
 0x2d5   : > { %v2646_v35 = vpop.f32.mrb[3].mxu1  ;;  %v858_v39 = vsel %vm854_vm7, %v850_v34, -inf }
 0x2d8   : > { %v1032_v36 = vpop.f32.mrb[4].mxu1 }
 0x2d9   : > { %v2656_v37 = vpop.f32.mrb[5].mxu1  ;;  %v1039_v38 = vsel %vm854_vm7, %v1032_v36, -inf }
 0x2da   : > { %1040 = vmax.xlane.f32.xlu1 %v1039_v38 }
 0x2de   : > { %859 = vmax.xlane.f32.xlu1 %v858_v39 }
 0x2ef   : > { %1059 = vrot.lane.b32.xlu1 %v2535_v20, %s3091_s27  ;;  %v2544_v20 = vsel %vm1374_vm10, 1.0, %v3088_v10 }
 0x2f0   : > { %v1377_v23 = vmul.f32 %v2544_v20, %v3453_v18  ;;  %v1378_v30 = vmul.f32 %v2544_v20, %v3464_v22 }
 0x2f3   : > { %878 = vrot.lane.b32.xlu1 %v2530_v19, %s3091_s27 }
 0x35f   : > { %v1038_v40 = vpop.xlane.xlu1 %1037  ;;  %v857_v51 = vpop.xlane.xlu0 %856 }
 0x360   : > { %v1042_v41 = vsub.f32 %v959_v29, %v1038_v40  ;;  %v861_v52 = vsub.f32 %v772_v28, %v857_v51 }
 0x362   : > { %v1044_v42 = vmul.f32 1.442695, %v1042_v41  ;;  %v863_v54 = vmul.f32 1.442695, %v861_v52 }
 0x364   : > { %2850 = vpow2.f32 %v1044_v42 }
 0x365   : > { %2852 = vpow2.f32 %v863_v54 }
 0x367   : > { %v1041_v43 = vpop.xlane.xlu1 %1040 }
 0x368   : > { %v1043_v56 = vsub.f32 %v1032_v36, %v1041_v43 }
 0x36a   : > { %v1046_v58 = vmul.f32 1.442695, %v1043_v56  ;;  %v2551_v56 = vsel %vm1711_vm13, 1.0, %v3088_v10 }
 0x36b   : > { %v860_v44 = vpop.xlane.xlu1 %859  ;;  %v1715_v17 = vmul.f32 %v2551_v56, %v3464_v22 }
 0x36c   : > { %v862_v55 = vsub.f32 %v850_v34, %v860_v44 }
 0x36e   : > { %v2851_v45 = vpop.eup %2850  ;;  %v865_v57 = vmul.f32 1.442695, %v862_v55 }
 0x36f   : > { %v1060_v46 = vpop.permute.xlu1 %1059  ;;  %v1048_v47 = vsel %vm854_vm7, %v2851_v45, 0.0  ;;  %v2853_v59 = vpop.eup %2852 }
 0x370   : > { %v1062_v48 = vmul.f32 %v1060_v46, %v3441_v14  ;;  %1049 = vadd.xlane.f32.xlu1 %v1048_v47  ;;  %v1063_v53 = vmul.f32 %v1060_v46, %v3444_v15  ;;  %2854 = vpow2.f32 %v865_v57  ;;  %v867_v60 = vsel %vm854_vm7, %v2853_v59, 0.0 }
 0x371   : > { %2856 = vpow2.f32 %v1046_v58 }
 0x372   : > { %1065 = vrot.lane.b32.xlu0 %v1062_v48, %s3091_s27 }
 0x373   : > { %v879_v49 = vpop.permute.xlu1 %878 }
 0x374   : > { %v881_v50 = vmul.f32 %v879_v49, %v3441_v14  ;;  %v882_v1 = vmul.f32 %v879_v49, %v3444_v15 }
 0x376   : > { %1219 = vrot.lane.b32.xlu0 %v881_v50, %s3091_s27 }
 0x37a   : > { %v2855_v61 = vpop.eup %2854 }
 0x37b   : > { %v870_v62 = vsel %vm854_vm7, %v2855_v61, 0.0  ;;  %v2857_v63 = vpop.eup %2856 }
 0x37c   : > { %v1051_v0 = vsel %vm854_vm7, %v2857_v63, 0.0 }
 0x381   : > { %1142 = vrot.lane.b32.xlu1 %v1063_v53, %s3091_s27 }
 0x395   : > { %868 = vadd.xlane.f32.xlu0 %v867_v60 }
 0x399   : > { %871 = vadd.xlane.f32.xlu0 %v870_v62 }
 0x39d   : > { %1052 = vadd.xlane.f32.xlu0 %v1051_v0 }
 0x3b3   : > { %1296 = vrot.lane.b32.xlu0 %v882_v1, %s3091_s27 }
 0x3e4   : > { %v1066_v2 = vpop.permute.xlu0 %1065 }
 0x3e5   : > { %2658 = vmatpush3.msra.mxu0 %v1066_v2 }
 0x3e6   : > { %2667 = vmatprep.subr.mxu0 %v3088_v10 }
 0x3e8   : > { %v1220_v8 = vpop.permute.xlu0 %1219 }
 0x3fd   : > { %v1050_v3 = vpop.xlane.xlu1 %1049 }
 0x3fe   : > { %2858 = vrcp.f32 %v1050_v3 }
 0x401   : > { %v1143_v4 = vpop.permute.xlu1 %1142 }
 0x402   : > { %2663 = vmatpush3.msra.mxu1 %v1143_v4 }
 0x403   : > { %2672 = vmatprep.subr.mxu1 %v3088_v10 }
 0x408   : > { %v2859_v5 = vpop.eup %2858 }
 0x409   : > { %v1056_v6 = vmul.f32 %v2859_v5, %v2851_v45 }
 0x40b   : > { %2660 = vmatmul.mubr.msk.f32.vlgmr.msra.gmra.mrb[4].mxu0 %vm854_vm7, %v1056_v6 }
 0x40c   : > { %2668 = vmatpush3.msra.mxu0 %v1220_v8  ;;  %2669 = vmatprep.mubr.msk.f32.mxu0 %vm3089_vm2, %v3088_v10 }
 0x40d   : > { %2677 = vmatprep.subr.mxu0 %v3088_v10 }
 0x422   : > { %v869_v11 = vpop.xlane.xlu0 %868 }
 0x423   : > { %2860 = vrcp.f32 %v869_v11 }
 0x426   : > { %v872_v12 = vpop.xlane.xlu0 %871 }
 0x42a   : > { %v1053_v13 = vpop.xlane.xlu0 %1052 }
 0x42b   : > { %2862 = vrcp.f32 %v1053_v13  ;;  %v2046_v13 = vld [vmem:[%s3380_s29] sm:$0xff] }
 0x42c   : > { %2864 = vrcp.f32 %v872_v12 }
 0x42d   : > { %v2861_v16 = vpop.eup %2860 }
 0x42e   : > { %v875_v19 = vmul.f32 %v2861_v16, %v2853_v59  ;;  %v1297_v27 = vpop.permute.xlu0 %1296  ;;  %v1714_v59 = vmul.f32 %v2551_v56, %v3453_v18  ;;  %v2047_v16 = vld [vmem:[%s3380_s29 + $0x8] sm:$0xff] }
 0x430   : > { %2670 = vmatmul.mubr.msk.f32.vlgmr.msra.gmra.mrb[4].mxu0 %vm854_vm7, %v875_v19  ;;  %v2747_v19 = vpack.c.bf16 %v2047_v16, %v2046_v13 }
 0x431   : > { %2678 = vmatpush3.xpose.msk.msra.mxu0 %vm605_vm1, %v3457_v21  ;;  %2679 = vmatprep.mubr.msk.f32.mxu0 %vm3089_vm2, %v3088_v10 }
 0x432   : > { %2687 = vmatprep.subr.mxu0 %v3088_v10 }
 0x434   : > { %2680 = vmatmul.mubr.msk.f32.vlgmr.msra.gmra.mrb[6].mxu0 %vm605_vm1, %v1377_v23 }
 0x435   : > { %v2863_v24 = vpop.eup %2862  ;;  %2689 = vmatprep.mubr.msk.f32.mxu0 %vm3089_vm2, %v3088_v10 }
 0x436   : > { %v1057_v26 = vmul.f32 %v2863_v24, %v2857_v63  ;;  %v2865_v28 = vpop.eup %2864 }
 0x437   : > { %v876_v29 = vmul.f32 %v2865_v28, %v2855_v61 }
 0x438   : > { %2665 = vmatmul.mubr.msk.f32.vlgmr.msra.gmra.mrb[6].mxu1 %vm854_vm7, %v1057_v26 }
 0x439   : > { %2673 = vmatpush3.msra.mxu1 %v1297_v27  ;;  %2674 = vmatprep.mubr.msk.f32.mxu1 %vm3089_vm2, %v3088_v10 }
 0x43a   : > { %2682 = vmatprep.subr.mxu1 %v3088_v10 }
 0x440   : > { %2675 = vmatmul.mubr.msk.f32.vlgmr.msra.gmra.mrb[6].mxu1 %vm854_vm7, %v876_v29  ;;  %v2048_v29 = vld [vmem:[%s3380_s29 + $0x10] sm:$0xff] }
 0x441   : > { %2683 = vmatpush3.xpose.msk.msra.mxu1 %vm605_vm1, %v3470_v25  ;;  %2684 = vmatprep.mubr.msk.f32.mxu1 %vm3089_vm2, %v3088_v10 }
 0x442   : > { %2692 = vmatprep.subr.mxu1 %v3088_v10 }
 0x444   : > { %2685 = vmatmul.mubr.msk.f32.vlgmr.msra.gmra.mrb[8].mxu1 %vm605_vm1, %v1378_v30  ;;  %v2049_v30 = vld [vmem:[%s3380_s29 + $0x18] sm:$0xff] }
 0x445   : > { %2694 = vmatprep.mubr.msk.f32.mxu1 %vm3089_vm2, %v3088_v10 }
 0x507   : > { %v1448_v31 = vpop.f32.mrb[6].mxu0 }
 0x508   : > { %v2681_v32 = vpop.f32.mrb[7].mxu0  ;;  %v1525_v33 = vsel %vm854_vm7, %v1448_v31, -inf }
 0x509   : > { %1526 = vmax.xlane.f32.xlu0 %v1525_v33 }
 0x517   : > { %v1521_v34 = vpop.f32.mrb[8].mxu1 }
 0x518   : > { %v2686_v35 = vpop.f32.mrb[9].mxu1  ;;  %v1528_v36 = vsel %vm854_vm7, %v1521_v34, -inf }
 0x519   : > { %1529 = vmax.xlane.f32.xlu1 %v1528_v36  ;;  %v2558_v36 = vld [vmem:[%s567_s25] ss:$0 sm:$0xff] }
 0x51f   : > { %1548 = vrot.lane.b32.xlu0 %v2544_v20, %s3091_s27 }
 0x596   : > { %v1527_v37 = vpop.xlane.xlu0 %1526 }
 0x597   : > { %v1531_v38 = vsub.f32 %v1448_v31, %v1527_v37  ;;  %v2751_v31 = vpack.c.bf16 %v2049_v30, %v2048_v29 }
 0x599   : > { %v1533_v39 = vmul.f32 1.442695, %v1531_v38 }
 0x59a   : > { %v1549_v40 = vpop.permute.xlu0 %1548 }
 0x59b   : > { %2866 = vpow2.f32 %v1533_v39  ;;  %v1552_v41 = vmul.f32 %v1549_v40, %v3444_v15  ;;  %v1551_v49 = vmul.f32 %v1549_v40, %v3441_v14 }
 0x59d   : > { %1631 = vrot.lane.b32.xlu0 %v1552_v41, %s3091_s27 }
 0x5a5   : > { %v2867_v42 = vpop.eup %2866 }
 0x5a6   : > { %v1530_v43 = vpop.xlane.xlu1 %1529  ;;  %v1537_v44 = vsel %vm854_vm7, %v2867_v42, 0.0 }
 0x5a7   : > { %v1532_v45 = vsub.f32 %v1521_v34, %v1530_v43  ;;  %1538 = vadd.xlane.f32.xlu1 %v1537_v44 }
 0x5a9   : > { %v1535_v46 = vmul.f32 1.442695, %v1532_v45 }
 0x5ab   : > { %2868 = vpow2.f32 %v1535_v46 }
 0x5b5   : > { %v2869_v47 = vpop.eup %2868 }
 0x5b6   : > { %v1540_v48 = vsel %vm854_vm7, %v2869_v47, 0.0 }
 0x5b7   : > { %1541 = vadd.xlane.f32.xlu1 %v1540_v48 }
 0x5c8   : > { %1554 = vrot.lane.b32.xlu1 %v1551_v49, %s3091_s27 }
 0x60f   : > { %v1632_v50 = vpop.permute.xlu0 %1631 }
 0x610   : > { %2693 = vmatpush3.msra.mxu1 %v1632_v50 }
 0x611   : > { %2702 = vmatprep.subr.mxu1 %v3088_v10 }
 0x634   : > { %v1539_v51 = vpop.xlane.xlu1 %1538 }
 0x635   : > { %2870 = vrcp.f32 %v1539_v51 }
 0x63f   : > { %v2871_v53 = vpop.eup %2870 }
 0x640   : > { %v1545_v54 = vmul.f32 %v2871_v53, %v2867_v42  ;;  %v2185_v53 = vld [vmem:[%s3382_s21] sm:$0xff] }
 0x644   : > { %v1542_v52 = vpop.xlane.xlu1 %1541 }
 0x645   : > { %2872 = vrcp.f32 %v1542_v52 }
 0x648   : > { %v1555_v55 = vpop.permute.xlu1 %1554 }
 0x649   : > { %2688 = vmatpush3.msra.mxu0 %v1555_v55 }
 0x64a   : > { %2690 = vmatmul.mubr.msk.f32.vlgmr.msra.gmra.mrb[4].mxu0 %vm854_vm7, %v1545_v54  ;;  %2697 = vmatprep.subr.mxu0 %v3088_v10  ;;  %v2186_v54 = vld [vmem:[%s3382_s21 + $0x8] sm:$0xff] }
 0x64b   : > { %2699 = vmatprep.mubr.msk.f32.mxu0 %vm3089_vm2, %v3088_v10  ;;  %v2755_v55 = vpack.c.bf16 %v2186_v54, %v2185_v53 }
 0x64f   : > { %v2873_v57 = vpop.eup %2872 }
 0x650   : > { %v1546_v58 = vmul.f32 %v2873_v57, %v2869_v47  ;;  %2698 = vmatpush3.xpose.msk.msra.mxu0 %vm605_vm1, %v3457_v21  ;;  %v2188_v57 = vld [vmem:[%s3382_s21 + $0x18] sm:$0xff] }
 0x651   : > { %2707 = vmatprep.subr.mxu0 %v3088_v10 }
 0x652   : > { %2695 = vmatmul.mubr.msk.f32.vlgmr.msra.gmra.mrb[6].mxu1 %vm854_vm7, %v1546_v58 }
 0x653   : > { %2703 = vmatpush3.xpose.msk.msra.mxu1 %vm605_vm1, %v3470_v25  ;;  %2700 = vmatmul.mubr.msk.f32.vlgmr.msra.gmra.mrb[8].mxu0 %vm605_vm1, %v1714_v59 }
 0x654   : > { %2704 = vmatprep.mubr.msk.f32.mxu1 %vm3089_vm2, %v3088_v10  ;;  %2712 = vmatprep.subr.mxu1 %v3088_v10 }
 0x655   : > { %2709 = vmatprep.mubr.msk.f32.mxu0 %vm3089_vm2, %v3088_v10 }
 0x656   : > { %2705 = vmatmul.mubr.msk.f32.vlgmr.msra.gmra.mrb[10].mxu1 %vm605_vm1, %v1715_v17 }
 0x657   : > { %2714 = vmatprep.mubr.msk.f32.mxu1 %vm3089_vm2, %v3088_v10 }
 0x726   : > { %v1785_v18 = vpop.f32.mrb[8].mxu0 }
 0x727   : > { %v2701_v21 = vpop.f32.mrb[9].mxu0  ;;  %v1862_v25 = vsel %vm854_vm7, %v1785_v18, -inf }
 0x728   : > { %1863 = vmax.xlane.f32.xlu0 %v1862_v25 }
 0x729   : > { %v1858_v60 = vpop.f32.mrb[10].mxu1 }
 0x72a   : > { %v2706_v61 = vpop.f32.mrb[11].mxu1  ;;  %v1865_v62 = vsel %vm854_vm7, %v1858_v60, -inf }
 0x72b   : > { %1866 = vmax.xlane.f32.xlu1 %v1865_v62  ;;  %v2561_v62 = vld [vmem:[%s573_s15] ss:$0 sm:$0xff] }
 0x73e   : > { %1885 = vrot.lane.b32.xlu0 %v2551_v56, %s3091_s27  ;;  %v2187_v56 = vld [vmem:[%s3382_s21 + $0x10] sm:$0xff] }
 0x73f   : > { %v2759_v58 = vpack.c.bf16 %v2188_v57, %v2187_v56 }
 0x7b5   : > { %v1864_v22 = vpop.xlane.xlu0 %1863 }
 0x7b6   : > { %v1868_v63 = vsub.f32 %v1785_v18, %v1864_v22 }
 0x7b8   : > { %v1870_v0 = vmul.f32 1.442695, %v1868_v63  ;;  %v1867_v1 = vpop.xlane.xlu1 %1866  ;;  %v2562_v63 = vld [vmem:[%s576_s11] ss:$0 sm:$0xff] }
 0x7b9   : > { %v1869_v2 = vsub.f32 %v1858_v60, %v1867_v1  ;;  %v1886_v10 = vpop.permute.xlu0 %1885 }
 0x7ba   : > { %2874 = vpow2.f32 %v1870_v0  ;;  %v1888_v3 = vmul.f32 %v1886_v10, %v3441_v14  ;;  %v1889_v12 = vmul.f32 %v1886_v10, %v3444_v15 }
 0x7bb   : > { %v1872_v4 = vmul.f32 1.442695, %v1869_v2 }
 0x7bc   : > { %1891 = vrot.lane.b32.xlu0 %v1888_v3, %s3091_s27 }
 0x7bd   : > { %2876 = vpow2.f32 %v1872_v4 }
 0x7c4   : > { %v2875_v5 = vpop.eup %2874 }
 0x7c5   : > { %v1874_v6 = vsel %vm854_vm7, %v2875_v5, 0.0 }
 0x7c6   : > { %1875 = vadd.xlane.f32.xlu1 %v1874_v6 }
 0x7c7   : > { %v2877_v8 = vpop.eup %2876 }
 0x7c8   : > { %v1877_v11 = vsel %vm854_vm7, %v2877_v8, 0.0 }
 0x7ca   : > { %1878 = vadd.xlane.f32.xlu1 %v1877_v11 }
 0x7db   : > { %1968 = vrot.lane.b32.xlu1 %v1889_v12, %s3091_s27 }
 0x82e   : > { %v1892_v14 = vpop.permute.xlu0 %1891 }
 0x82f   : > { %2708 = vmatpush3.msra.mxu0 %v1892_v14 }
 0x830   : > { %2748 = vmatprep.subr.bf16.mxu0 %v2747_v19 }
 0x853   : > { %v1876_v20 = vpop.xlane.xlu1 %1875 }
 0x854   : > { %2878 = vrcp.f32 %v1876_v20 }
 0x857   : > { %v1879_v23 = vpop.xlane.xlu1 %1878 }
 0x858   : > { %2880 = vrcp.f32 %v1879_v23 }
 0x85b   : > { %v1969_v24 = vpop.permute.xlu1 %1968 }
 0x85c   : > { %2713 = vmatpush3.msra.mxu1 %v1969_v24 }
 0x85d   : > { %2756 = vmatprep.subr.bf16.mxu1 %v2755_v55 }
 0x85e   : > { %v2879_v26 = vpop.eup %2878 }
 0x85f   : > { %v1882_v27 = vmul.f32 %v2879_v26, %v2875_v5  ;;  %v2563_v5 = vld [vmem:[%s570_s26] ss:$0 sm:$0xff] }
 0x861   : > { %2710 = vmatmul.mubr.msk.f32.vlgmr.msra.gmra.mrb[4].mxu0 %vm854_vm7, %v1882_v27 }
 0x862   : > { %v2881_v15 = vpop.eup %2880  ;;  %2750 = vmatpush3.bf16.msra.mxu0 %v2747_v19 }
 0x863   : > { %v1883_v28 = vmul.f32 %v2881_v15, %v2877_v8  ;;  %2752 = vmatprep.subr.bf16.mxu0 %v2751_v31 }
 0x865   : > { %2715 = vmatmul.mubr.msk.f32.vlgmr.msra.gmra.mrb[6].mxu1 %vm854_vm7, %v1883_v28 }
 0x866   : > { %2754 = vmatpush3.bf16.msra.mxu0 %v2751_v31  ;;  %2758 = vmatpush3.bf16.msra.mxu1 %v2755_v55 }
 0x867   : > { %2760 = vmatprep.subr.bf16.mxu1 %v2759_v58 }
 0x86a   : > { %2762 = vmatpush3.bf16.msra.mxu1 %v2759_v58 }
 0x934   : > { %v1963_v32 = vpop.f32.mrb[4].mxu0 }
 0x935   : > { %v2711_v33 = vpop.f32.mrb[5].mxu0  ;;  %2725 = vmatprep.mubr.msk.f32.mxu0 %vm605_vm1, %v1963_v32 }
 0x938   : > { %v2040_v34 = vpop.f32.mrb[6].mxu1 }
 0x939   : > { %v2716_v35 = vpop.f32.mrb[7].mxu1  ;;  %2726 = vmatmul.mubr.msk.f32.vlgmr.msra.gmra.mrb[10].mxu0 %vm605_vm1, %v2040_v34 }
 0xa0c   : > { %v2727_v37 = vpop.f32.mrb[10].mxu0 }
 0xa0d   : > { %v2135_v38 = vadd.f32 %v2727_v37, %v2558_v36  ;;  %v2129_v39 = vpop.f32.mrb[11].mxu0 }
 0xa0e   : > { %v2130_v40 = vadd.f32 %v2558_v36, %v2129_v39  ;;  %v2566_v39 = vld [vmem:[%s579_s24] ss:$0 sm:$0xff] }
 0xa0f   : > { %v2139_v41 = vadd.f32 %v2135_v38, %v3426_v9 }
 0xa10   : > { %v2138_v42 = vadd.f32 %v2130_v40, %v3422_v7 }
 0xa11   : > { %v2145_v43 = vsel %vm605_vm1, %v2139_v41, 0.0 }
 0xa12   : > { %2146 = vadd.xlane.f32.xlu1 %v2145_v43  ;;  %v2142_v44 = vsel %vm605_vm1, %v2138_v42, 0.0 }
 0xa13   : > { %2143 = vadd.xlane.f32.xlu0 %v2142_v44 }
 0xa9f   : > { %v2147_v45 = vpop.xlane.xlu1 %2146 }
 0xaa0   : > { %v2150_v46 = vmul.f32 0.03125, %v2147_v45  ;;  %v2144_v47 = vpop.xlane.xlu0 %2143 }
 0xaa1   : > { %v2149_v48 = vmul.f32 0.03125, %v2144_v47 }
 0xaa2   : > { %v2152_v49 = vsub.f32 %v2139_v41, %v2150_v46  ;;  %v2567_v41 = vld [vmem:[%s582_s3] ss:$0 sm:$0xff] }
 0xaa3   : > { %v2151_v50 = vsub.f32 %v2138_v42, %v2149_v48 }
 0xaa4   : > { %v2154_v7 = vmul.f32 %v2152_v49, %v2152_v49 }
 0xaa5   : > { %v2153_v51 = vmul.f32 %v2151_v50, %v2151_v50 }
 0xaa6   : > { %v2158_v52 = vsel %vm605_vm1, %v2154_v7, 0.0 }
 0xaa7   : > { %v2155_v9 = vsel %vm605_vm1, %v2153_v51, 0.0 }
 0xaa8   : > { %2156 = vadd.xlane.f32.xlu0 %v2155_v9 }
 0xaac   : > { %2159 = vadd.xlane.f32.xlu0 %v2158_v52 }
 0xb35   : > { %v2157_v59 = vpop.xlane.xlu0 %2156 }
 0xb36   : > { %v2161_v17 = vmul.f32 0.03125, %v2157_v59 }
 0xb38   : > { %v2163_v18 = vadd.f32 1e-06, %v2161_v17 }
 0xb39   : > { %v2160_v21 = vpop.xlane.xlu0 %2159 }
 0xb3a   : > { %2882 = vrsqrt.f32 %v2163_v18  ;;  %v2162_v25 = vmul.f32 0.03125, %v2160_v21 }
 0xb3c   : > { %v2164_v60 = vadd.f32 1e-06, %v2162_v25 }
 0xb3e   : > { %2884 = vrsqrt.f32 %v2164_v60 }
 0xb44   : > { %v2883_v61 = vpop.eup %2882 }
 0xb45   : > { %v2167_v22 = vmul.f32 %v2883_v61, %v2151_v50 }
 0xb47   : > { %v2175_v0 = vmul.f32 %v2561_v62, %v2167_v22 }
 0xb48   : > { %v2885_v1 = vpop.eup %2884 }
 0xb49   : > { %v2168_v2 = vmul.f32 %v2885_v1, %v2152_v49  ;;  %v2183_v10 = vadd.f32 %v2562_v63, %v2175_v0 }
 0xb4b   : > { %v2176_v3 = vmul.f32 %v2561_v62, %v2168_v2  ;;  %2736 = vmatprep.mubr.msk.f32.mxu1 %vm605_vm1, %v2183_v10 }
 0xb4d   : > { %v2184_v4 = vadd.f32 %v2562_v63, %v2176_v3 }
 0xb4f   : > { %2737 = vmatmul.mubr.msk.f32.vlgmr.msra.gmra.mrb[12].mxu1 %vm605_vm1, %v2184_v4 }
 0xc22   : > { %v2738_v6 = vpop.f32.mrb[12].mxu1 }
 0xc23   : > { %v2268_v8 = vpop.f32.mrb[13].mxu1  ;;  %v2274_v11 = vadd.f32 %v2738_v6, %v2563_v5 }
 0xc24   : > { %v2269_v12 = vadd.f32 %v2563_v5, %v2268_v8 }
 0xc25   : > { %v2278_v19 = vadd.f32 %v2274_v11, %v2184_v4 }
 0xc26   : > { %v2277_v13 = vadd.f32 %v2269_v12, %v2183_v10 }
 0xc27   : > { %v2284_v14 = vsel %vm605_vm1, %v2278_v19, 0.0 }
 0xc28   : > { %v2281_v16 = vsel %vm605_vm1, %v2277_v13, 0.0 }
 0xc29   : > { %2282 = vadd.xlane.f32.xlu0 %v2281_v16 }
 0xc2d   : > { %2285 = vadd.xlane.f32.xlu0 %v2284_v14 }
 0xcb6   : > { %v2283_v20 = vpop.xlane.xlu0 %2282 }
 0xcb7   : > { %v2287_v23 = vmul.f32 0.03125, %v2283_v20 }
 0xcb9   : > { %v2289_v24 = vsub.f32 %v2277_v13, %v2287_v23 }
 0xcba   : > { %v2286_v26 = vpop.xlane.xlu0 %2285 }
 0xcbb   : > { %v2288_v27 = vmul.f32 0.03125, %v2286_v26  ;;  %v2291_v15 = vmul.f32 %v2289_v24, %v2289_v24 }
 0xcbd   : > { %v2290_v28 = vsub.f32 %v2278_v19, %v2288_v27  ;;  %v2293_v29 = vsel %vm605_vm1, %v2291_v15, 0.0 }
 0xcbe   : > { %2294 = vadd.xlane.f32.xlu0 %v2293_v29 }
 0xcbf   : > { %v2292_v30 = vmul.f32 %v2290_v28, %v2290_v28 }
 0xcc1   : > { %v2296_v31 = vsel %vm605_vm1, %v2292_v30, 0.0 }
 0xcc2   : > { %2297 = vadd.xlane.f32.xlu1 %v2296_v31 }
 0xd4b   : > { %v2295_v32 = vpop.xlane.xlu0 %2294 }
 0xd4c   : > { %v2299_v33 = vmul.f32 0.03125, %v2295_v32 }
 0xd4e   : > { %v2301_v34 = vadd.f32 1e-06, %v2299_v33 }
 0xd4f   : > { %v2298_v35 = vpop.xlane.xlu1 %2297 }
 0xd50   : > { %2886 = vrsqrt.f32 %v2301_v34  ;;  %v2300_v36 = vmul.f32 0.03125, %v2298_v35 }
 0xd52   : > { %v2302_v37 = vadd.f32 1e-06, %v2300_v36 }
 0xd54   : > { %2888 = vrsqrt.f32 %v2302_v37 }
 0xd5a   : > { %v2887_v38 = vpop.eup %2886 }
 0xd5b   : > { %v2305_v40 = vmul.f32 %v2887_v38, %v2289_v24 }
 0xd5d   : > { %v2313_v42 = vmul.f32 %v2566_v39, %v2305_v40 }
 0xd5e   : > { %v2889_v43 = vpop.eup %2888 }
 0xd5f   : > { %v2321_v44 = vadd.f32 %v2567_v41, %v2313_v42  ;;  %v2306_v45 = vmul.f32 %v2889_v43, %v2290_v28  ;;  %2328 = sbr.rel (%p2568_p8) target bundleno = 3430 (0xd66), region = 88 }
 0xd61   : > { %2323 = vst.msk [vmem:[#allocation2] sm:$0xff] %vm605_vm1, %v2321_v44  ;;  %v2314_v46 = vmul.f32 %v2566_v39, %v2306_v45  ;;  %2329 = vst.msk [vmem:[#allocation11] sm:$0xff] (!%p2568_p8), %vm605_vm1, %v2321_v44 }
 0xd63   : > { %v2322_v47 = vadd.f32 %v2567_v41, %v2314_v46 }
 0xd65   : > { %2324 = vst.msk [vmem:[#allocation2 + $0x8] sm:$0xff] %vm605_vm1, %v2322_v47  ;;  %2330 = vst.msk [vmem:[#allocation11 + $0x8] sm:$0xff] (!%p2568_p8), %vm605_vm1, %v2322_v47 }
 0xd66 PF: > { %p2806_p10 = scmp.eq.s32.totalorder %s3244_s13, 1  ;;  %s3092_s12 = smov [#allocation11]  }
 0xd67   : > { %s2337_s24 = sshll.u32 %s3092_s12, 4  ;;  %s2338_s24 = int_to_ptr.vmem [resolvable:$true] %s2337_s24 }
 0xd68   : > { %s3008_s3 = scalar_lea.vmem %s2338_s24, 256  ;;  %p3015_p12 = scmp.lt.s32.totalorder %s2338_s24, %s2338_s24 }
 0xd69   : > { %p3009_p9 = scmp.ne.s32.totalorder %s2338_s24, %s3008_s3  ;;  %p3016_p2 = scmp.lt.s32.totalorder %s3008_s3, %s3008_s3 }
 0xd6b   : > { %p3010_p13 = pnand %p3009_p9, %p2806_p10  ;;  %p3017_p1 = por %p3016_p2, %p3015_p12 }
 0xd6d   : > { %p3011_p5 = pneg %p3010_p13 }
 0xd6f   : > { %p3018_p7 = pnand %p3017_p1, %p3011_p5 }
 0xd71   : > { %3021 = shalt.err (!%p3018_p7)
}
 0xd72   : > { %s3737_s16 = sld [smem:[#allocation22_spill]] }
 0xd78   : > { %s3022_s10 = scalar_lea.hbm %s3737_s16, 256 }
 0xd79   : > { %p3023_p3 = scmp.ne.s32.totalorder %s3737_s16, %s3022_s10  ;;  %p3028_p0 = scmp.lt.u32.totalorder %s3022_s10, %s3737_s16 }
 0xd7b   : > { %p3024_p6 = pnand %p3023_p3, %p2806_p10 }
 0xd7d   : > { %p3025_p11 = pneg %p3024_p6 }
 0xd7f   : > { %p3030_p4 = pnand %p3028_p0, %p3025_p11 }
 0xd81   : > { %3033 = shalt.err (!%p3030_p4)
}
 0xd82   : > { %s3093_s25 = smov 128   ;;  %s3094_s21 = smov 8  }
 0xd83   : > { %2786 = dma.vmem_to_hbm [thread:$0]  (%p2806_p10), %s2338_s24, 256, %s3737_s16, [#allocation5], %s3093_s25, %s3093_s25, %s3094_s21  }
 0xd84   : > { %3063 = dma.done.wait (%p2806_p10), [#allocation5], 256  }
 0xd85   : > { %3065 = vsyncadd (%p2806_p10), [#allocation5], 4294967040 }
 0xd86 PF: > { %s3738_s20 = sld [smem:[#allocation16_spill]]  ;;  %s3739_s1 = sld [smem:[#allocation17_spill]] }
 0xd87   : > { %s3740_s17 = smov %s3072_s18  ;;  %s3741_s18 = smov %s3076_s19 }
 0xd8c   : > { %p26_p8 = scmp.ge.s32.totalorder %s3738_s20, 4   ;;  %s3742_s19 = smov %s3739_s1 }
 0xd8e   :  { %28 = sbr.rel (!%p26_p8) target bundleno = 13 (0xd), region = 159 }
 0xd95   :  { %2353 = vsyncpa [#allocation4], 1 }
 0xd96   :  { %2355 = vsyncpa [#allocation4 + $0x1], 1 }
 0xd97   :  { %2356 = vsyncpa [#allocation7], 1 }
 0xd98   :  { %2358 = vsyncpa [#allocation7 + $0x1], 1 }
 0xd99   :  { %2359 = vsyncpa [#allocation10], 1 }
 0xd9a   :  { %2361 = vsyncpa [#allocation10 + $0x1], 1 }
 0xd9b   :  { %2362 = vsyncpa [#allocation5], 1 }
 0xd9c   :  { %2364 = vsyncpa [#allocation5 + $0x1], 1 }

</bundles_post_ra>
